<compile_context>
chip_gen: v7x
topology: tpu7x:2x2x1
jax: 0.10.0
libtpu: 0.0.40
codegen_flags: <defaults>
</compile_context>

<pallas_src>
import numpy as np
import jax
import jax.numpy as jnp
from jax.experimental import pallas as pl
from jax.experimental.pallas import tpu as pltpu


def _round_up(a, b):
    return (a + b - 1) // b * b


def _resample_kernel(x_ref, g_ref, o_ref):
    # x_ref: (tm, H*W)     g_ref: (H*W, Ho*Wo)  one-hot, bf16
    # o_ref: (tm, Ho*Wo)
    g = g_ref[...]
    x = x_ref[...]

    if x_ref.dtype == jnp.bfloat16:
        # Native bf16 MXU path; 0/1 weights + f32 accumulate -> exact gather.
        y = jnp.dot(x, g, preferred_element_type=jnp.float32)
    else:
        # Exact gather for f32 (and other float) inputs: split the value into
        # three bf16 pieces that reconstruct it exactly (hi + mid + lo == x),
        # run three native bf16 MXU passes and sum in f32.  Each output picks
        # exactly one nonzero term per pass, so every add is exact.
        xf = x.astype(jnp.float32)
        hi = xf.astype(jnp.bfloat16)
        r1 = xf - hi.astype(jnp.float32)
        mid = r1.astype(jnp.bfloat16)
        lo = (r1 - mid.astype(jnp.float32)).astype(jnp.bfloat16)
        y = (jnp.dot(hi, g, preferred_element_type=jnp.float32)
             + jnp.dot(mid, g, preferred_element_type=jnp.float32)
             + jnp.dot(lo, g, preferred_element_type=jnp.float32))

    o_ref[...] = y.astype(o_ref.dtype)


def resample_forward(x_nchw, to_size):
    """Pallas implementation of Resample.forward == nn.Upsample(to_size)(x).

    Nearest-neighbour (nn.Upsample default), NCHW input, dtype preserving.
    """
    N, C, H, W = x_nchw.shape
    if isinstance(to_size, (tuple, list)):
        H_out, W_out = int(to_size[0]), int(to_size[1])
    else:
        H_out = W_out = int(to_size)

    HW_in, HW_out = H * W, H_out * W_out
    M = N * C
    dtype = x_nchw.dtype
    itemsize = jnp.dtype(dtype).itemsize

    # ---- static one-hot gather matrix, built on the host with NumPy --------
    # PyTorch 'nearest': src_index = floor(dst_index * in_size / out_size);
    # exact integer arithmetic avoids float-rounding discrepancies.
    row_src = (np.arange(H_out, dtype=np.int64) * H) // H_out          # (Ho,)
    col_src = (np.arange(W_out, dtype=np.int64) * W) // W_out          # (Wo,)
    src_flat = (row_src[:, None] * W + col_src[None, :]).reshape(-1)   # (Ho*Wo,)
    g_np = np.zeros((HW_in, HW_out), dtype=np.float32)
    g_np[src_flat, np.arange(HW_out)] = 1.0
    g = jnp.asarray(g_np, dtype=jnp.bfloat16)        # 0/1 is exact in bf16

    # ---- VMEM budgeting (padded, double-buffered footprint) ----------------
    hw_in_p = _round_up(HW_in, 128)                  # lane padding
    hw_out_p = _round_up(HW_out, 128)
    g_pad = _round_up(HW_in, 16) * hw_out_p * 2      # one bf16 copy, padded
    if g_pad > 8 * 2**20:
        # TODO(synk): large-spatial fallback not implemented (see header).
        raise NotImplementedError(
            "Resample: spatial size too large for the resident-G Pallas path")

    try:
        vmem_cap = int(pltpu.get_tpu_info().vmem_capacity_bytes)
    except Exception:
        vmem_cap = 64 * 2**20                        # conservative (v7x per-TC)
    budget = max(vmem_cap // 4, 2 * g_pad + 8 * 2**20)

    # Per-row cost: double-buffered input + output tiles (padded) plus the
    # f32/bf16 split temporaries (~16 B per input element on the f32 path).
    per_row = 2 * hw_in_p * itemsize + 2 * hw_out_p * itemsize + hw_in_p * 16
    tm = min(max(1, (budget - 2 * g_pad) // per_row), 512, M)
    if M > 8:
        tm = min(tm, -(-M // 2))     # >= 2 grid steps: pipelining + v7x 2 TCs
    tm = max(8, (tm // 8) * 8)       # sublane multiple
    grid = (pl.cdiv(M, tm),)

    est_step = (2 * tm * (hw_in_p + hw_out_p) * itemsize
                + tm * hw_in_p * 16 + 2 * g_pad)
    vmem_limit = int(min(max(2 * est_step, 32 * 2**20), 3 * vmem_cap // 4))

    # Memory-bound cost hint for XLA's scheduler.
    passes = 1 if dtype == jnp.bfloat16 else 3
    cost = pl.CostEstimate(
        flops=2 * passes * M * HW_in * HW_out,
        bytes_accessed=M * (HW_in + HW_out) * itemsize + HW_in * HW_out * 2,
        transcendentals=0)

    # Free reshapes only (NCHW is row-major over (M, H*W)); no transposes.
    x2 = x_nchw.reshape(M, HW_in)

    out2 = pl.pallas_call(
        _resample_kernel,
        out_shape=jax.ShapeDtypeStruct((M, HW_out), dtype),
        grid=grid,
        in_specs=[
            pl.BlockSpec((tm, HW_in), lambda i: (i, 0)),        # row tile
            pl.BlockSpec((HW_in, HW_out), lambda i: (0, 0)),    # resident G
        ],
        out_specs=pl.BlockSpec((tm, HW_out), lambda i: (i, 0)),
        compiler_params=pltpu.CompilerParams(
            dimension_semantics=("parallel",),                  # megacore
            vmem_limit_bytes=vmem_limit),
        cost_estimate=cost,
    )(x2, g)

    return out2.reshape(N, C, H_out, W_out)


def _nearest_ref(x, hw):
    H_out, W_out = hw
    _, _, H, W = x.shape
    rs = (jnp.arange(H_out) * H) // H_out
    cs = (jnp.arange(W_out) * W) // W_out
    return x[:, :, rs, :][:, :, :, cs]


if __name__ == "__main__":
    key = jax.random.PRNGKey(0)
    # Small NCHW input: batch=2, channels=4, spatial=16x16.
    x = jax.random.normal(key, (2, 4, 16, 16), dtype=jnp.float32)

    # Integer scale factor: 16x16 -> 32x32 (typical VQ-VAE decoder resample).
    y = resample_forward(x, (32, 32))
    jax.block_until_ready(y)
    assert y.shape == (2, 4, 32, 32)
    assert jnp.allclose(y, _nearest_ref(x, (32, 32)), rtol=1e-6, atol=0.0), \
        "nearest 16->32 mismatch"

    # Non-integer ratio: 16x16 -> 24x40 (exercises general to_size).
    y2 = resample_forward(x, (24, 40))
    jax.block_until_ready(y2)
    assert y2.shape == (2, 4, 24, 40)
    assert jnp.allclose(y2, _nearest_ref(x, (24, 40)), rtol=1e-6, atol=0.0), \
        "nearest 16->24x40 mismatch"

    # Native-bf16 path (single MXU pass, exact 0/1 selection).
    xb = x.astype(jnp.bfloat16)
    yb = resample_forward(xb, (32, 32))
    jax.block_until_ready(yb)
    assert yb.dtype == jnp.bfloat16
    assert jnp.allclose(yb.astype(jnp.float32),
                        _nearest_ref(xb, (32, 32)).astype(jnp.float32),
                        rtol=1e-6, atol=0.0), "bf16 nearest mismatch"

    print("KERNEL_OK")
</pallas_src>

<mosaic_0001>
module attributes {stable_mosaic.version = 11 : i64} {
  func.func @_resample_kernel(%arg0: i32, %arg1: memref<8x256xf32, #tpu.memory_space<vmem>>, %arg2: memref<256x1024xbf16, #tpu.memory_space<vmem>>, %arg3: memref<8x1024xf32, #tpu.memory_space<vmem>>) attributes {dimension_semantics = [#tpu.dimension_semantics<parallel>], iteration_bounds = array<i64: 1>, scalar_prefetch = 0 : i64, scratch_operands = 0 : i64, tpu.core_type = #tpu.core_type<tc>, window_params = [{transform_indices = @transform_0, window_bounds = array<i64: 8, 256>}, {pipeline_mode = #tpu.pipeline_mode<synchronous>, transform_indices = @transform_1, window_bounds = array<i64: 256, 1024>}, {transform_indices = @transform_2, window_bounds = array<i64: 8, 1024>}]} {
    %c0 = arith.constant 0 : index
    %c0_0 = arith.constant 0 : index
    %0 = vector.load %arg2[%c0, %c0_0] : memref<256x1024xbf16, #tpu.memory_space<vmem>>, vector<256x1024xbf16>
    %c0_1 = arith.constant 0 : index
    %c0_2 = arith.constant 0 : index
    %1 = vector.load %arg1[%c0_1, %c0_2] : memref<8x256xf32, #tpu.memory_space<vmem>>, vector<8x256xf32>
    %2 = arith.truncf %1 : vector<8x256xf32> to vector<8x256xbf16>
    %3 = arith.extf %2 : vector<8x256xbf16> to vector<8x256xf32>
    %4 = arith.subf %1, %3 : vector<8x256xf32>
    %5 = arith.truncf %4 : vector<8x256xf32> to vector<8x256xbf16>
    %6 = arith.extf %5 : vector<8x256xbf16> to vector<8x256xf32>
    %7 = arith.subf %4, %6 : vector<8x256xf32>
    %8 = arith.truncf %7 : vector<8x256xf32> to vector<8x256xbf16>
    %cst = arith.constant dense<0.000000e+00> : vector<8x1024xf32>
    %9 = tpu.matmul %2, %0, %cst {dimension_numbers = #tpu.dot_dimension_numbers<[1], [0], [0], [1], [0, 0, 1, 1], [], []>} : vector<8x256xbf16>, vector<256x1024xbf16>, vector<8x1024xf32> -> vector<8x1024xf32>
    %cst_3 = arith.constant dense<0.000000e+00> : vector<8x1024xf32>
    %10 = tpu.matmul %5, %0, %cst_3 {dimension_numbers = #tpu.dot_dimension_numbers<[1], [0], [0], [1], [0, 0, 1, 1], [], []>} : vector<8x256xbf16>, vector<256x1024xbf16>, vector<8x1024xf32> -> vector<8x1024xf32>
    %11 = arith.addf %9, %10 : vector<8x1024xf32>
    %cst_4 = arith.constant dense<0.000000e+00> : vector<8x1024xf32>
    %12 = tpu.matmul %8, %0, %cst_4 {dimension_numbers = #tpu.dot_dimension_numbers<[1], [0], [0], [1], [0, 0, 1, 1], [], []>} : vector<8x256xbf16>, vector<256x1024xbf16>, vector<8x1024xf32> -> vector<8x1024xf32>
    %13 = arith.addf %11, %12 : vector<8x1024xf32>
    %c0_5 = arith.constant 0 : index
    %c0_6 = arith.constant 0 : index
    %14 = vector.load %arg3[%c0_5, %c0_6] : memref<8x1024xf32, #tpu.memory_space<vmem>>, vector<8x1024xf32>
    tpu.vector_store %arg3[%c0_5, %c0_6], %13 {strides = array<i32>} : memref<8x1024xf32, #tpu.memory_space<vmem>>, vector<8x1024xf32>,
    return
  }
  func.func @transform_0(%arg0: i32) -> (i32, i32) {
    %c0_i32 = arith.constant 0 : i32
    %c0_i32_0 = arith.constant 0 : i32
    return %arg0, %c0_i32 : i32, i32
  }
  func.func @transform_1(%arg0: i32) -> (i32, i32) {
    %c0_i32 = arith.constant 0 : i32
    %c0_i32_0 = arith.constant 0 : i32
    %c0_i32_1 = arith.constant 0 : i32
    return %c0_i32, %c0_i32_0 : i32, i32
  }
  func.func @transform_2(%arg0: i32) -> (i32, i32) {
    %c0_i32 = arith.constant 0 : i32
    %c0_i32_0 = arith.constant 0 : i32
    return %arg0, %c0_i32 : i32, i32
  }
}

</mosaic_0001>

<bundles_post_ra>
// kernel: tpu_custom_call.1
= control target key start
LH: loop header
LB: loop body
LE: loop exit
PB: predicated region body
PF: predicated region fallthrough
CT: control target
= control target key end

     0   :  { %7 = vsyncpa [#allocation3], 0  ;;  %s2336_s0 = inlined_call_operand.hbm [shape: f32[8,256], index: 0, kind: input, shape index: {}]   ;;  %s2337_s1 = inlined_call_operand.hbm [shape: bf16[256,1024], index: 1, kind: input, shape index: {}]   ;;  %s2338_s2 = inlined_call_operand.hbm [shape: f32[8,1024], index: 2, kind: output, shape index: {}]  }
   0x1   :  { %8 = vsyncpa [#allocation6], 0 }
   0x2   :  { %9 = vsyncpa [#allocation4], 0  ;;  %s1583_s9 = smov [#allocation2]   ;;  %s1584_s11 = smov [#allocation5]  }
   0x3   :  { %s16_s10 = sshll.u32 %s1583_s9, 4  ;;  %s25_s12 = sshll.u32 %s1584_s11, 4  ;;  %s17_s10 = int_to_ptr.vmem [resolvable:$true] %s16_s10  ;;  %s1603_s12 = int_to_ptr.vmem [resolvable:$true] %s25_s12 }
   0x4   :  { %s1511_s15 = scalar_lea.hbm %s2336_s0, 256 }
   0x5   :  { %p1512_p0 = scmp.ne.s32.totalorder %s2336_s0, %s1511_s15  ;;  %p1515_p1 = scmp.lt.u32.totalorder %s1511_s15, %s2336_s0 }
   0x7   :  { %p1517_p2 = pnand %p1515_p1, %p1512_p0 }
   0x9   :  { %1520 = shalt.err (!%p1517_p2)
}
   0xa   :  { %s1521_s20 = scalar_lea.vmem %s17_s10, 256  ;;  %p1526_p4 = scmp.lt.s32.totalorder %s17_s10, %s17_s10 }
   0xb   :  { %p1522_p3 = scmp.ne.s32.totalorder %s17_s10, %s1521_s20  ;;  %p1527_p5 = scmp.lt.s32.totalorder %s1521_s20, %s1521_s20 }
   0xd   :  { %p1528_p6 = por %p1527_p5, %p1526_p4 }
   0xf   :  { %p1529_p7 = pnand %p1528_p6, %p1522_p3 }
  0x11   :  { %1532 = shalt.err (!%p1529_p7)
}
  0x12   :  { %19 = dma.hbm_to_vmem [thread:$0]  %s2336_s0, 256, %s17_s10, [#allocation3]  }
  0x13   :  { %s1533_s25 = scalar_lea.hbm %s2337_s1, 16384 }
  0x14   :  { %p1534_p8 = scmp.ne.s32.totalorder %s2337_s1, %s1533_s25  ;;  %p1537_p9 = scmp.lt.u32.totalorder %s1533_s25, %s2337_s1 }
  0x16   :  { %p1539_p10 = pnand %p1537_p9, %p1534_p8 }
  0x18   :  { %1542 = shalt.err (!%p1539_p10)
}
  0x19   :  { %s1543_s30 = scalar_lea.vmem %s1603_s12, 16384  ;;  %p1548_p12 = scmp.lt.s32.totalorder %s1603_s12, %s1603_s12 }
  0x1a   :  { %p1544_p11 = scmp.ne.s32.totalorder %s1603_s12, %s1543_s30  ;;  %p1549_p13 = scmp.lt.s32.totalorder %s1543_s30, %s1543_s30 }
  0x1c   :  { %p1550_p0 = por %p1549_p13, %p1548_p12 }
  0x1e   :  { %p1551_p1 = pnand %p1550_p0, %p1544_p11 }
  0x20   :  { %1554 = shalt.err (!%p1551_p1)
}
  0x21   :  { %s1585_s0 = smov 512   ;;  %s1586_s3 = smov 32  }
  0x22   :  { %31 = dma.hbm_to_vmem [thread:$0]  %s2337_s1, 16384, %s1603_s12, [#allocation6], %s1585_s0, %s1585_s0, %s1586_s3  }
  0x23   :  { %1577 = dma.done.wait [#allocation3], 256  }
  0x24   :  { %1578 = vsyncadd [#allocation3], 4294967040 }
  0x25   :  { %1579 = dma.done.wait [#allocation6], 16384  }
  0x26   :  { %1580 = vsyncadd [#allocation6], 4294950912  ;;  %v38_v0 = vld [vmem:[#allocation5] sm:$0xff]  ;;  %v39_v2 = vld [vmem:[#allocation5 + $0x8] sm:$0xff]  ;;  %s1587_s1 = smov [#allocation7]  }
  0x27   :  { %v42_v1 = vld [vmem:[#allocation5 + $0x20] sm:$0xff]  ;;  %v43_v4 = vld [vmem:[#allocation5 + $0x28] sm:$0xff]  ;;  %v167_v53 = vld [vmem:[#allocation2 + $0x8] sm:$0xff]  ;;  %s1336_s6 = sshll.u32 %s1587_s1, 4  ;;  %s1337_s6 = int_to_ptr.vmem [resolvable:$true] %s1336_s6 }
  0x28   :  { %v1634_v3 = vcombine.high %v38_v0, %v42_v1  ;;  %v1636_v5 = vcombine.low %v38_v0, %v42_v1  ;;  %v46_v6 = vld [vmem:[#allocation5 + $0x40] sm:$0xff]  ;;  %v1638_v8 = vcombine.high %v39_v2, %v43_v4  ;;  %v1640_v9 = vcombine.low %v39_v2, %v43_v4  ;;  %v47_v11 = vld [vmem:[#allocation5 + $0x48] sm:$0xff]  ;;  %s1555_s7 = scalar_lea.vmem %s1337_s6, 1024  ;;  %p1560_p3 = scmp.lt.s32.totalorder %s1337_s6, %s1337_s6 }
  0x29   :  { %v50_v7 = vld [vmem:[#allocation5 + $0x60] sm:$0xff]  ;;  %v51_v12 = vld [vmem:[#allocation5 + $0x68] sm:$0xff]  ;;  %v1708_v57 = vpack.c.bf16 %v167_v53, %v167_v53  ;;  %p1556_p2 = scmp.ne.s32.totalorder %s1337_s6, %s1555_s7  ;;  %p1561_p4 = scmp.lt.s32.totalorder %s1555_s7, %s1555_s7 }
  0x2a   :  { %v1642_v10 = vcombine.high %v46_v6, %v50_v7  ;;  %v54_v13 = vld [vmem:[#allocation5 + $0x80] sm:$0xff]  ;;  %822 = vmatprep.subr.bf16.mxu0 %v1634_v3  ;;  %v1645_v14 = vcombine.high %v47_v11, %v51_v12  ;;  %v55_v16 = vld [vmem:[#allocation5 + $0x88] sm:$0xff]  ;;  %863 = vmatprep.subr.bf16.mxu1 %v1638_v8  ;;  %v1649_v18 = vcombine.low %v46_v6, %v50_v7 }
  0x2b   :  { %v58_v15 = vld [vmem:[#allocation5 + $0xa0] sm:$0xff]  ;;  %v59_v17 = vld [vmem:[#allocation5 + $0xa8] sm:$0xff]  ;;  %823 = vmatpush1.bf16.msra.mxu0 %v1636_v5  ;;  %864 = vmatpush1.bf16.msra.mxu1 %v1640_v9  ;;  %v1653_v19 = vcombine.low %v47_v11, %v51_v12  ;;  %v171_v61 = vunpack.c.l.bf16 %v1708_v57  ;;  %p1562_p5 = por %p1561_p4, %p1560_p3 }
  0x2c   :  { %824 = vmatprep.subr.bf16.mxu0 %v1642_v10  ;;  %v1655_v20 = vcombine.high %v54_v13, %v58_v15  ;;  %865 = vmatprep.subr.bf16.mxu1 %v1645_v14  ;;  %v1658_v21 = vcombine.high %v55_v16, %v59_v17  ;;  %v62_v22 = vld [vmem:[#allocation5 + $0xc0] sm:$0xff]  ;;  %v63_v24 = vld [vmem:[#allocation5 + $0xc8] sm:$0xff]  ;;  %v1661_v26 = vcombine.low %v54_v13, %v58_v15 }
  0x2d   :  { %v66_v23 = vld [vmem:[#allocation5 + $0xe0] sm:$0xff]  ;;  %v67_v25 = vld [vmem:[#allocation5 + $0xe8] sm:$0xff]  ;;  %v1665_v27 = vcombine.low %v55_v16, %v59_v17  ;;  %v1723_v4 = vsub.f32 %v167_v53, %v171_v61  ;;  %p1563_p6 = pnand %p1562_p5, %p1556_p2 }
  0x2e   :  { %v1667_v28 = vcombine.high %v62_v22, %v66_v23  ;;  %v1670_v29 = vcombine.high %v63_v24, %v67_v25  ;;  %v70_v30 = vld [vmem:[#allocation5 + $0x100] sm:$0xff]  ;;  %v71_v32 = vld [vmem:[#allocation5 + $0x108] sm:$0xff]  ;;  %v1673_v34 = vcombine.low %v62_v22, %v66_v23  ;;  %v1677_v35 = vcombine.low %v63_v24, %v67_v25 }
  0x2f   :  { %825 = vmatpush1.bf16.msra.mxu0 %v1649_v18  ;;  %866 = vmatpush1.bf16.msra.mxu1 %v1653_v19  ;;  %v74_v31 = vld [vmem:[#allocation5 + $0x120] sm:$0xff]  ;;  %v75_v33 = vld [vmem:[#allocation5 + $0x128] sm:$0xff]  ;;  %2499 = vst [vmem:[#allocation11_spill] sm:$0xff] %v1723_v4  ;;  %v1730_v12 = vpack.c.bf16 %v1723_v4, %v1723_v4 }
  0x30   :  { %826 = vmatprep.subr.bf16.mxu0 %v1655_v20  ;;  %867 = vmatprep.subr.bf16.mxu1 %v1658_v21  ;;  %v1679_v36 = vcombine.high %v70_v30, %v74_v31  ;;  %v1682_v37 = vcombine.high %v71_v32, %v75_v33  ;;  %v78_v38 = vld [vmem:[#allocation5 + $0x140] sm:$0xff]  ;;  %v79_v40 = vld [vmem:[#allocation5 + $0x148] sm:$0xff]  ;;  %v1685_v42 = vcombine.low %v70_v30, %v74_v31 }
  0x31   :  { %v82_v39 = vld [vmem:[#allocation5 + $0x160] sm:$0xff]  ;;  %v83_v41 = vld [vmem:[#allocation5 + $0x168] sm:$0xff]  ;;  %v1689_v43 = vcombine.low %v71_v32, %v75_v33  ;;  %2500 = vst [vmem:[#allocation12_spill] sm:$0xff] %v1730_v12  ;;  %854 = vmatprep.mubr.bf16.mxu0 %v1730_v12  ;;  %895 = vmatprep.mubr.bf16.mxu1 %v1730_v12 }
  0x32   :  { %v1691_v44 = vcombine.high %v78_v38, %v82_v39  ;;  %v1694_v45 = vcombine.high %v79_v40, %v83_v41  ;;  %v86_v46 = vld [vmem:[#allocation5 + $0x180] sm:$0xff]  ;;  %v87_v48 = vld [vmem:[#allocation5 + $0x188] sm:$0xff]  ;;  %v1697_v50 = vcombine.low %v78_v38, %v82_v39  ;;  %v1701_v51 = vcombine.low %v79_v40, %v83_v41 }
  0x33   :  { %827 = vmatpush1.bf16.msra.mxu0 %v1661_v26  ;;  %868 = vmatpush1.bf16.msra.mxu1 %v1665_v27  ;;  %v90_v47 = vld [vmem:[#allocation5 + $0x1a0] sm:$0xff]  ;;  %v91_v49 = vld [vmem:[#allocation5 + $0x1a8] sm:$0xff] }
  0x34   :  { %828 = vmatprep.subr.bf16.mxu0 %v1667_v28  ;;  %869 = vmatprep.subr.bf16.mxu1 %v1670_v29  ;;  %v1703_v52 = vcombine.high %v86_v46, %v90_v47  ;;  %v1706_v54 = vcombine.high %v87_v48, %v91_v49  ;;  %v94_v55 = vld [vmem:[#allocation5 + $0x1c0] sm:$0xff]  ;;  %v95_v58 = vld [vmem:[#allocation5 + $0x1c8] sm:$0xff]  ;;  %v1711_v60 = vcombine.low %v86_v46, %v90_v47 }
  0x35   :  { %v98_v56 = vld [vmem:[#allocation5 + $0x1e0] sm:$0xff]  ;;  %v99_v59 = vld [vmem:[#allocation5 + $0x1e8] sm:$0xff]  ;;  %v1716_v62 = vcombine.low %v87_v48, %v91_v49 }
  0x36   :  { %v1718_v63 = vcombine.high %v94_v55, %v98_v56  ;;  %v1721_v0 = vcombine.high %v95_v58, %v99_v59  ;;  %v102_v1 = vld [vmem:[#allocation5 + $0x200] sm:$0xff]  ;;  %v103_v6 = vld [vmem:[#allocation5 + $0x208] sm:$0xff]  ;;  %v1726_v11 = vcombine.low %v94_v55, %v98_v56  ;;  %v1734_v13 = vcombine.low %v95_v58, %v99_v59 }
  0x37   :  { %829 = vmatpush1.bf16.msra.mxu0 %v1673_v34  ;;  %870 = vmatpush1.bf16.msra.mxu1 %v1677_v35  ;;  %v106_v2 = vld [vmem:[#allocation5 + $0x220] sm:$0xff]  ;;  %v107_v7 = vld [vmem:[#allocation5 + $0x228] sm:$0xff] }
  0x38   :  { %830 = vmatprep.subr.bf16.mxu0 %v1679_v36  ;;  %871 = vmatprep.subr.bf16.mxu1 %v1682_v37  ;;  %v1736_v15 = vcombine.high %v102_v1, %v106_v2  ;;  %v1739_v16 = vcombine.high %v103_v6, %v107_v7  ;;  %v110_v17 = vld [vmem:[#allocation5 + $0x240] sm:$0xff]  ;;  %v111_v23 = vld [vmem:[#allocation5 + $0x248] sm:$0xff]  ;;  %v1744_v25 = vcombine.low %v102_v1, %v106_v2 }
  0x39   :  { %v114_v22 = vld [vmem:[#allocation5 + $0x260] sm:$0xff]  ;;  %v115_v24 = vld [vmem:[#allocation5 + $0x268] sm:$0xff]  ;;  %v1748_v30 = vcombine.low %v103_v6, %v107_v7 }
  0x3a   :  { %v1750_v31 = vcombine.high %v110_v17, %v114_v22  ;;  %v1753_v32 = vcombine.high %v111_v23, %v115_v24  ;;  %v118_v33 = vld [vmem:[#allocation5 + $0x280] sm:$0xff]  ;;  %v119_v39 = vld [vmem:[#allocation5 + $0x288] sm:$0xff]  ;;  %v1756_v41 = vcombine.low %v110_v17, %v114_v22  ;;  %v1760_v46 = vcombine.low %v111_v23, %v115_v24 }
  0x3b   :  { %831 = vmatpush1.bf16.msra.mxu0 %v1685_v42  ;;  %872 = vmatpush1.bf16.msra.mxu1 %v1689_v43  ;;  %v122_v38 = vld [vmem:[#allocation5 + $0x2a0] sm:$0xff]  ;;  %v123_v40 = vld [vmem:[#allocation5 + $0x2a8] sm:$0xff] }
  0x3c   :  { %832 = vmatprep.subr.bf16.mxu0 %v1691_v44  ;;  %873 = vmatprep.subr.bf16.mxu1 %v1694_v45  ;;  %2501 = vst [vmem:[#allocation13_spill] sm:$0xff] %v1750_v31  ;;  %2502 = vst [vmem:[#allocation14_spill] sm:$0xff] %v1753_v32  ;;  %v1762_v47 = vcombine.high %v118_v33, %v122_v38  ;;  %v1765_v48 = vcombine.high %v119_v39, %v123_v40  ;;  %v126_v49 = vld [vmem:[#allocation5 + $0x2c0] sm:$0xff]  ;;  %v127_v55 = vld [vmem:[#allocation5 + $0x2c8] sm:$0xff] }
  0x3d   :  { %2503 = vst [vmem:[#allocation15_spill] sm:$0xff] %v1756_v41  ;;  %2504 = vst [vmem:[#allocation16_spill] sm:$0xff] %v1760_v46  ;;  %v130_v53 = vld [vmem:[#allocation5 + $0x2e0] sm:$0xff]  ;;  %v131_v56 = vld [vmem:[#allocation5 + $0x2e8] sm:$0xff]  ;;  %v1768_v58 = vcombine.low %v118_v33, %v122_v38  ;;  %v1772_v59 = vcombine.low %v119_v39, %v123_v40 }
  0x3e   :  { %2505 = vst [vmem:[#allocation17_spill] sm:$0xff] %v1762_v47  ;;  %2506 = vst [vmem:[#allocation18_spill] sm:$0xff] %v1765_v48  ;;  %v1774_v61 = vcombine.high %v126_v49, %v130_v53  ;;  %v1777_v1 = vcombine.high %v127_v55, %v131_v56  ;;  %v134_v2 = vld [vmem:[#allocation5 + $0x300] sm:$0xff]  ;;  %v135_v7 = vld [vmem:[#allocation5 + $0x308] sm:$0xff]  ;;  %v1780_v22 = vcombine.low %v126_v49, %v130_v53 }
  0x3f   :  { %833 = vmatpush1.bf16.msra.mxu0 %v1697_v50  ;;  %874 = vmatpush1.bf16.msra.mxu1 %v1701_v51  ;;  %2507 = vst [vmem:[#allocation19_spill] sm:$0xff] %v1768_v58  ;;  %2508 = vst [vmem:[#allocation20_spill] sm:$0xff] %v1772_v59  ;;  %v138_v6 = vld [vmem:[#allocation5 + $0x320] sm:$0xff]  ;;  %v139_v17 = vld [vmem:[#allocation5 + $0x328] sm:$0xff]  ;;  %v1784_v23 = vcombine.low %v127_v55, %v131_v56 }
  0x40   :  { %834 = vmatprep.subr.bf16.mxu0 %v1703_v52  ;;  %875 = vmatprep.subr.bf16.mxu1 %v1706_v54  ;;  %2509 = vst [vmem:[#allocation21_spill] sm:$0xff] %v1774_v61  ;;  %2510 = vst [vmem:[#allocation22_spill] sm:$0xff] %v1777_v1  ;;  %v1786_v24 = vcombine.high %v134_v2, %v138_v6  ;;  %v1789_v33 = vcombine.high %v135_v7, %v139_v17  ;;  %v142_v38 = vld [vmem:[#allocation5 + $0x340] sm:$0xff]  ;;  %v143_v40 = vld [vmem:[#allocation5 + $0x348] sm:$0xff] }
  0x41   :  { %2511 = vst [vmem:[#allocation23_spill] sm:$0xff] %v1780_v22  ;;  %2512 = vst [vmem:[#allocation24_spill] sm:$0xff] %v1784_v23  ;;  %v146_v39 = vld [vmem:[#allocation5 + $0x360] sm:$0xff]  ;;  %v147_v4 = vld [vmem:[#allocation5 + $0x368] sm:$0xff]  ;;  %v1792_v49 = vcombine.low %v134_v2, %v138_v6  ;;  %v1796_v55 = vcombine.low %v135_v7, %v139_v17 }
  0x42   :  { %2513 = vst [vmem:[#allocation25_spill] sm:$0xff] %v1786_v24  ;;  %2514 = vst [vmem:[#allocation26_spill] sm:$0xff] %v1789_v33  ;;  %v166_v53 = vld [vmem:[#allocation2] sm:$0xff]  ;;  %v1798_v56 = vcombine.high %v142_v38, %v146_v39  ;;  %v1806_v2 = vcombine.low %v142_v38, %v146_v39  ;;  %v1810_v6 = vcombine.low %v143_v40, %v147_v4 }
  0x43   :  { %835 = vmatpush1.bf16.msra.mxu0 %v1711_v60  ;;  %876 = vmatpush1.bf16.msra.mxu1 %v1716_v62  ;;  %2515 = vst [vmem:[#allocation27_spill] sm:$0xff] %v1792_v49  ;;  %2516 = vst [vmem:[#allocation28_spill] sm:$0xff] %v1796_v55 }
  0x44   :  { %836 = vmatprep.subr.bf16.mxu0 %v1718_v63  ;;  %877 = vmatprep.subr.bf16.mxu1 %v1721_v0  ;;  %2517 = vst [vmem:[#allocation29_spill] sm:$0xff] %v1798_v56  ;;  %2520 = vst [vmem:[#allocation32_spill] sm:$0xff] %v1806_v2 }
  0x45   :  { %2521 = vst [vmem:[#allocation33_spill] sm:$0xff] %v1810_v6 }
  0x47   :  { %837 = vmatpush1.bf16.msra.mxu0 %v1726_v11  ;;  %878 = vmatpush1.bf16.msra.mxu1 %v1734_v13 }
  0x48   :  { %838 = vmatprep.subr.bf16.mxu0 %v1736_v15  ;;  %879 = vmatprep.subr.bf16.mxu1 %v1739_v16 }
  0x4b   :  { %839 = vmatpush1.bf16.msra.mxu0 %v1744_v25  ;;  %880 = vmatpush1.bf16.msra.mxu1 %v1748_v30 }
  0x4c   :  { %840 = vmatprep.subr.bf16.mxu0 %v1750_v31  ;;  %881 = vmatprep.subr.bf16.mxu1 %v1753_v32 }
  0x4f   :  { %841 = vmatpush1.bf16.msra.mxu0 %v1756_v41  ;;  %882 = vmatpush1.bf16.msra.mxu1 %v1760_v46 }
  0x50   :  { %842 = vmatprep.subr.bf16.mxu0 %v1762_v47  ;;  %883 = vmatprep.subr.bf16.mxu1 %v1765_v48  ;;  %v155_v48 = vld [vmem:[#allocation5 + $0x3a8] sm:$0xff] }
  0x51   :  { %v163_v47 = vld [vmem:[#allocation5 + $0x3e8] sm:$0xff] }
  0x53   :  { %843 = vmatpush1.bf16.msra.mxu0 %v1768_v58  ;;  %884 = vmatpush1.bf16.msra.mxu1 %v1772_v59  ;;  %v154_v59 = vld [vmem:[#allocation5 + $0x3a0] sm:$0xff]  ;;  %v151_v58 = vld [vmem:[#allocation5 + $0x388] sm:$0xff] }
  0x54   :  { %844 = vmatprep.subr.bf16.mxu0 %v1774_v61  ;;  %885 = vmatprep.subr.bf16.mxu1 %v1777_v1  ;;  %v1801_v1 = vcombine.high %v143_v40, %v147_v4  ;;  %v150_v61 = vld [vmem:[#allocation5 + $0x380] sm:$0xff]  ;;  %v1815_v17 = vcombine.high %v151_v58, %v155_v48  ;;  %v1823_v4 = vcombine.low %v151_v58, %v155_v48 }
  0x55   :  { %v1812_v7 = vcombine.high %v150_v61, %v154_v59  ;;  %v1819_v38 = vcombine.low %v150_v61, %v154_v59 }
  0x56   :  { %2518 = vst [vmem:[#allocation30_spill] sm:$0xff] %v1801_v1  ;;  %2523 = vst [vmem:[#allocation35_spill] sm:$0xff] %v1815_v17 }
  0x57   :  { %845 = vmatpush1.bf16.msra.mxu0 %v1780_v22  ;;  %886 = vmatpush1.bf16.msra.mxu1 %v1784_v23  ;;  %v1803_v22 = vpack.c.bf16 %v166_v53, %v166_v53  ;;  %2522 = vst [vmem:[#allocation34_spill] sm:$0xff] %v1812_v7  ;;  %v159_v23 = vld [vmem:[#allocation5 + $0x3c8] sm:$0xff]  ;;  %2524 = vst [vmem:[#allocation36_spill] sm:$0xff] %v1819_v38 }
  0x58   :  { %846 = vmatprep.subr.bf16.mxu0 %v1786_v24  ;;  %887 = vmatprep.subr.bf16.mxu1 %v1789_v33  ;;  %v158_v33 = vld [vmem:[#allocation5 + $0x3c0] sm:$0xff]  ;;  %2525 = vst [vmem:[#allocation37_spill] sm:$0xff] %v1823_v4  ;;  %v1828_v40 = vcombine.high %v159_v23, %v163_v47  ;;  %v1837_v48 = vcombine.low %v159_v23, %v163_v47 }
  0x59   :  { %2519 = vst [vmem:[#allocation31_spill] sm:$0xff] %v1803_v22  ;;  %v162_v24 = vld [vmem:[#allocation5 + $0x3e0] sm:$0xff] }
  0x5a   :  { %v1825_v39 = vcombine.high %v158_v33, %v162_v24  ;;  %2527 = vst [vmem:[#allocation39_spill] sm:$0xff] %v1828_v40  ;;  %v1833_v59 = vcombine.low %v158_v33, %v162_v24  ;;  %2530 = vst [vmem:[#allocation42_spill] sm:$0xff] %v1837_v48  ;;  %v49_v24 = vld [vmem:[#allocation5 + $0x58] sm:$0xff] }
  0x5b   :  { %847 = vmatpush1.bf16.msra.mxu0 %v1792_v49  ;;  %888 = vmatpush1.bf16.msra.mxu1 %v1796_v55  ;;  %v170_v49 = vunpack.c.l.bf16 %v1803_v22  ;;  %v41_v55 = vld [vmem:[#allocation5 + $0x18] sm:$0xff] }
  0x5c   :  { %848 = vmatprep.subr.bf16.mxu0 %v1798_v56  ;;  %889 = vmatprep.subr.bf16.mxu1 %v1801_v1  ;;  %2526 = vst [vmem:[#allocation38_spill] sm:$0xff] %v1825_v39  ;;  %v40_v1 = vld [vmem:[#allocation5 + $0x10] sm:$0xff]  ;;  %v45_v22 = vld [vmem:[#allocation5 + $0x38] sm:$0xff]  ;;  %2529 = vst [vmem:[#allocation41_spill] sm:$0xff] %v1833_v59 }
  0x5d   :  { %v44_v56 = vld [vmem:[#allocation5 + $0x30] sm:$0xff]  ;;  %v1830_v46 = vsub.f32 %v166_v53, %v170_v49  ;;  %v1842_v61 = vcombine.high %v41_v55, %v45_v22  ;;  %v53_v33 = vld [vmem:[#allocation5 + $0x78] sm:$0xff]  ;;  %v1853_v47 = vcombine.low %v41_v55, %v45_v22 }
  0x5e   :  { %v1839_v58 = vcombine.high %v40_v1, %v44_v56  ;;  %v1849_v53 = vcombine.low %v40_v1, %v44_v56  ;;  %v1867_v22 = vcombine.low %v49_v24, %v53_v33 }
  0x5f   :  { %849 = vmatpush1.bf16.msra.mxu0 %v1806_v2  ;;  %890 = vmatpush1.bf16.msra.mxu1 %v1810_v6  ;;  %2528 = vst [vmem:[#allocation40_spill] sm:$0xff] %v1830_v46  ;;  %2532 = vst [vmem:[#allocation44_spill] sm:$0xff] %v1842_v61  ;;  %v1846_v49 = vpack.c.bf16 %v1830_v46, %v1830_v46  ;;  %v56_v46 = vld [vmem:[#allocation5 + $0x90] sm:$0xff] }
  0x60   :  { %850 = vmatprep.subr.bf16.mxu0 %v1812_v7  ;;  %891 = vmatprep.subr.bf16.mxu1 %v1815_v17  ;;  %2531 = vst [vmem:[#allocation43_spill] sm:$0xff] %v1839_v58  ;;  %v48_v17 = vld [vmem:[#allocation5 + $0x50] sm:$0xff]  ;;  %2534 = vst [vmem:[#allocation46_spill] sm:$0xff] %v1849_v53 }
  0x61   :  { %v52_v7 = vld [vmem:[#allocation5 + $0x70] sm:$0xff]  ;;  %2533 = vst [vmem:[#allocation45_spill] sm:$0xff] %v1846_v49  ;;  %2535 = vst [vmem:[#allocation47_spill] sm:$0xff] %v1853_v47 }
  0x62   :  { %v1855_v23 = vcombine.high %v48_v17, %v52_v7  ;;  %v1863_v1 = vcombine.low %v48_v17, %v52_v7  ;;  %2539 = vst [vmem:[#allocation51_spill] sm:$0xff] %v1867_v22 }
  0x63   :  { %851 = vmatpush1.bf16.msra.mxu0 %v1819_v38  ;;  %892 = vmatpush1.bf16.msra.mxu1 %v1823_v4  ;;  %v57_v4 = vld [vmem:[#allocation5 + $0x98] sm:$0xff] }
  0x64   :  { %852 = vmatprep.subr.bf16.mxu0 %v1825_v39  ;;  %893 = vmatprep.subr.bf16.mxu1 %v1828_v40  ;;  %2536 = vst [vmem:[#allocation48_spill] sm:$0xff] %v1855_v23  ;;  %v1858_v40 = vcombine.high %v49_v24, %v53_v33  ;;  %v60_v39 = vld [vmem:[#allocation5 + $0xb0] sm:$0xff]  ;;  %2538 = vst [vmem:[#allocation50_spill] sm:$0xff] %v1863_v1 }
  0x65   :  { %v1869_v55 = vcombine.high %v56_v46, %v60_v39  ;;  %v1877_v7 = vcombine.low %v56_v46, %v60_v39 }
  0x66   :  { %2537 = vst [vmem:[#allocation49_spill] sm:$0xff] %v1858_v40 }
  0x67   :  { %853 = vmatpush1.bf16.msra.mxu0 %v1833_v59  ;;  %894 = vmatpush1.bf16.msra.mxu1 %v1837_v48  ;;  %v61_v59 = vld [vmem:[#allocation5 + $0xb8] sm:$0xff]  ;;  %2540 = vst [vmem:[#allocation52_spill] sm:$0xff] %v1869_v55  ;;  %2542 = vst [vmem:[#allocation54_spill] sm:$0xff] %v1877_v7 }
  0x68   :  { %904 = vmatprep.subr.bf16.mxu0 %v1839_v58  ;;  %945 = vmatprep.subr.bf16.mxu1 %v1842_v61  ;;  %v1872_v56 = vcombine.high %v57_v4, %v61_v59  ;;  %v64_v61 = vld [vmem:[#allocation5 + $0xd0] sm:$0xff]  ;;  %v65_v48 = vld [vmem:[#allocation5 + $0xd8] sm:$0xff]  ;;  %v1881_v17 = vcombine.low %v57_v4, %v61_v59 }
  0x69   :  { %v68_v58 = vld [vmem:[#allocation5 + $0xf0] sm:$0xff] }
  0x6a   :  { %855 = vmatmul.mubr.bf16.vlgmr.msra.gmra.mrb[0].mxu0 %v1846_v49  ;;  %896 = vmatmul.mubr.bf16.vlgmr.msra.gmra.mrb[0].mxu1 %v1846_v49  ;;  %2541 = vst [vmem:[#allocation53_spill] sm:$0xff] %v1872_v56  ;;  %2543 = vst [vmem:[#allocation55_spill] sm:$0xff] %v1881_v17  ;;  %v1883_v24 = vcombine.high %v64_v61, %v68_v58  ;;  %v1889_v46 = vcombine.low %v64_v61, %v68_v58 }
  0x6b   :  { %905 = vmatpush1.bf16.msra.mxu0 %v1849_v53  ;;  %946 = vmatpush1.bf16.msra.mxu1 %v1853_v47  ;;  %v69_v53 = vld [vmem:[#allocation5 + $0xf8] sm:$0xff] }
  0x6c   :  { %906 = vmatprep.subr.bf16.mxu0 %v1855_v23  ;;  %947 = vmatprep.subr.bf16.mxu1 %v1858_v40  ;;  %2544 = vst [vmem:[#allocation56_spill] sm:$0xff] %v1883_v24  ;;  %v1886_v33 = vcombine.high %v65_v48, %v69_v53  ;;  %v72_v40 = vld [vmem:[#allocation5 + $0x110] sm:$0xff]  ;;  %v73_v47 = vld [vmem:[#allocation5 + $0x118] sm:$0xff]  ;;  %2546 = vst [vmem:[#allocation58_spill] sm:$0xff] %v1889_v46  ;;  %v1893_v4 = vcombine.low %v65_v48, %v69_v53 }
  0x6d   :  { %936 = vmatprep.mubr.bf16.mxu0 %v1730_v12  ;;  %977 = vmatprep.mubr.bf16.mxu1 %v1730_v12  ;;  %v76_v23 = vld [vmem:[#allocation5 + $0x130] sm:$0xff]  ;;  %v77_v12 = vld [vmem:[#allocation5 + $0x138] sm:$0xff] }
  0x6e   :  { %2545 = vst [vmem:[#allocation57_spill] sm:$0xff] %v1886_v33  ;;  %2547 = vst [vmem:[#allocation59_spill] sm:$0xff] %v1893_v4  ;;  %v1895_v39 = vcombine.high %v72_v40, %v76_v23  ;;  %v1898_v59 = vcombine.high %v73_v47, %v77_v12  ;;  %v1901_v58 = vcombine.low %v72_v40, %v76_v23 }
  0x6f   :  { %907 = vmatpush1.bf16.msra.mxu0 %v1863_v1  ;;  %948 = vmatpush1.bf16.msra.mxu1 %v1867_v22  ;;  %v81_v22 = vld [vmem:[#allocation5 + $0x158] sm:$0xff]  ;;  %v1905_v48 = vcombine.low %v73_v47, %v77_v12 }
  0x70   :  { %908 = vmatprep.subr.bf16.mxu0 %v1869_v55  ;;  %949 = vmatprep.subr.bf16.mxu1 %v1872_v56  ;;  %2548 = vst [vmem:[#allocation60_spill] sm:$0xff] %v1895_v39  ;;  %2549 = vst [vmem:[#allocation61_spill] sm:$0xff] %v1898_v59  ;;  %v80_v56 = vld [vmem:[#allocation5 + $0x150] sm:$0xff]  ;;  %v85_v1 = vld [vmem:[#allocation5 + $0x178] sm:$0xff] }
  0x71   :  { %v84_v55 = vld [vmem:[#allocation5 + $0x170] sm:$0xff]  ;;  %2550 = vst [vmem:[#allocation62_spill] sm:$0xff] %v1901_v58  ;;  %2551 = vst [vmem:[#allocation63_spill] sm:$0xff] %v1905_v48  ;;  %v1910_v53 = vcombine.high %v81_v22, %v85_v1  ;;  %v1917_v12 = vcombine.low %v81_v22, %v85_v1 }
  0x72   :  { %v1907_v61 = vcombine.high %v80_v56, %v84_v55  ;;  %v1913_v40 = vcombine.low %v80_v56, %v84_v55 }
  0x73   :  { %909 = vmatpush1.bf16.msra.mxu0 %v1877_v7  ;;  %950 = vmatpush1.bf16.msra.mxu1 %v1881_v17  ;;  %2553 = vst [vmem:[#allocation65_spill] sm:$0xff] %v1910_v53  ;;  %v89_v17 = vld [vmem:[#allocation5 + $0x198] sm:$0xff]  ;;  %2555 = vst [vmem:[#allocation67_spill] sm:$0xff] %v1917_v12 }
  0x74   :  { %910 = vmatprep.subr.bf16.mxu0 %v1883_v24  ;;  %951 = vmatprep.subr.bf16.mxu1 %v1886_v33  ;;  %2552 = vst [vmem:[#allocation64_spill] sm:$0xff] %v1907_v61  ;;  %v88_v33 = vld [vmem:[#allocation5 + $0x190] sm:$0xff]  ;;  %v93_v7 = vld [vmem:[#allocation5 + $0x1b8] sm:$0xff]  ;;  %2554 = vst [vmem:[#allocation66_spill] sm:$0xff] %v1913_v40 }
  0x75   :  { %v92_v24 = vld [vmem:[#allocation5 + $0x1b0] sm:$0xff]  ;;  %v1922_v23 = vcombine.high %v89_v17, %v93_v7  ;;  %v1929_v1 = vcombine.low %v89_v17, %v93_v7 }
  0x76   :  { %v1919_v47 = vcombine.high %v88_v33, %v92_v24  ;;  %v1925_v55 = vcombine.low %v88_v33, %v92_v24 }
  0x77   :  { %911 = vmatpush1.bf16.msra.mxu0 %v1889_v46  ;;  %952 = vmatpush1.bf16.msra.mxu1 %v1893_v4  ;;  %2557 = vst [vmem:[#allocation69_spill] sm:$0xff] %v1922_v23  ;;  %v97_v4 = vld [vmem:[#allocation5 + $0x1d8] sm:$0xff]  ;;  %2559 = vst [vmem:[#allocation71_spill] sm:$0xff] %v1929_v1 }
  0x78   :  { %912 = vmatprep.subr.bf16.mxu0 %v1895_v39  ;;  %953 = vmatprep.subr.bf16.mxu1 %v1898_v59  ;;  %2556 = vst [vmem:[#allocation68_spill] sm:$0xff] %v1919_v47  ;;  %v96_v59 = vld [vmem:[#allocation5 + $0x1d0] sm:$0xff]  ;;  %v101_v46 = vld [vmem:[#allocation5 + $0x1f8] sm:$0xff]  ;;  %2558 = vst [vmem:[#allocation70_spill] sm:$0xff] %v1925_v55 }
  0x79   :  { %v100_v39 = vld [vmem:[#allocation5 + $0x1f0] sm:$0xff]  ;;  %v1934_v56 = vcombine.high %v97_v4, %v101_v46  ;;  %v1941_v7 = vcombine.low %v97_v4, %v101_v46 }
  0x7a   :  { %v1931_v22 = vcombine.high %v96_v59, %v100_v39  ;;  %v1937_v24 = vcombine.low %v96_v59, %v100_v39 }
  0x7b   :  { %913 = vmatpush1.bf16.msra.mxu0 %v1901_v58  ;;  %954 = vmatpush1.bf16.msra.mxu1 %v1905_v48  ;;  %2561 = vst [vmem:[#allocation73_spill] sm:$0xff] %v1934_v56  ;;  %v105_v48 = vld [vmem:[#allocation5 + $0x218] sm:$0xff]  ;;  %2563 = vst [vmem:[#allocation75_spill] sm:$0xff] %v1941_v7 }
  0x7c   :  { %914 = vmatprep.subr.bf16.mxu0 %v1907_v61  ;;  %955 = vmatprep.subr.bf16.mxu1 %v1910_v53  ;;  %2560 = vst [vmem:[#allocation72_spill] sm:$0xff] %v1931_v22  ;;  %v104_v53 = vld [vmem:[#allocation5 + $0x210] sm:$0xff]  ;;  %v109_v58 = vld [vmem:[#allocation5 + $0x238] sm:$0xff]  ;;  %2562 = vst [vmem:[#allocation74_spill] sm:$0xff] %v1937_v24 }
  0x7d   :  { %v108_v61 = vld [vmem:[#allocation5 + $0x230] sm:$0xff]  ;;  %v1946_v33 = vcombine.high %v105_v48, %v109_v58  ;;  %v1953_v46 = vcombine.low %v105_v48, %v109_v58 }
  0x7e   :  { %v1943_v17 = vcombine.high %v104_v53, %v108_v61  ;;  %v1949_v39 = vcombine.low %v104_v53, %v108_v61 }
  0x7f   :  { %915 = vmatpush1.bf16.msra.mxu0 %v1913_v40  ;;  %956 = vmatpush1.bf16.msra.mxu1 %v1917_v12  ;;  %2565 = vst [vmem:[#allocation77_spill] sm:$0xff] %v1946_v33  ;;  %v113_v12 = vld [vmem:[#allocation5 + $0x258] sm:$0xff]  ;;  %2567 = vst [vmem:[#allocation79_spill] sm:$0xff] %v1953_v46 }
  0x80   :  { %916 = vmatprep.subr.bf16.mxu0 %v1919_v47  ;;  %957 = vmatprep.subr.bf16.mxu1 %v1922_v23  ;;  %2564 = vst [vmem:[#allocation76_spill] sm:$0xff] %v1943_v17  ;;  %v112_v23 = vld [vmem:[#allocation5 + $0x250] sm:$0xff]  ;;  %v117_v40 = vld [vmem:[#allocation5 + $0x278] sm:$0xff]  ;;  %2566 = vst [vmem:[#allocation78_spill] sm:$0xff] %v1949_v39 }
  0x81   :  { %v116_v47 = vld [vmem:[#allocation5 + $0x270] sm:$0xff]  ;;  %v1958_v59 = vcombine.high %v113_v12, %v117_v40  ;;  %v1965_v58 = vcombine.low %v113_v12, %v117_v40 }
  0x82   :  { %v1955_v4 = vcombine.high %v112_v23, %v116_v47  ;;  %v1961_v61 = vcombine.low %v112_v23, %v116_v47 }
  0x83   :  { %917 = vmatpush1.bf16.msra.mxu0 %v1925_v55  ;;  %958 = vmatpush1.bf16.msra.mxu1 %v1929_v1  ;;  %2569 = vst [vmem:[#allocation81_spill] sm:$0xff] %v1958_v59  ;;  %v121_v1 = vld [vmem:[#allocation5 + $0x298] sm:$0xff]  ;;  %2571 = vst [vmem:[#allocation83_spill] sm:$0xff] %v1965_v58 }
  0x84   :  { %918 = vmatprep.subr.bf16.mxu0 %v1931_v22  ;;  %959 = vmatprep.subr.bf16.mxu1 %v1934_v56  ;;  %2568 = vst [vmem:[#allocation80_spill] sm:$0xff] %v1955_v4  ;;  %v120_v56 = vld [vmem:[#allocation5 + $0x290] sm:$0xff]  ;;  %v125_v55 = vld [vmem:[#allocation5 + $0x2b8] sm:$0xff]  ;;  %2570 = vst [vmem:[#allocation82_spill] sm:$0xff] %v1961_v61 }
  0x85   :  { %v124_v22 = vld [vmem:[#allocation5 + $0x2b0] sm:$0xff]  ;;  %v1970_v53 = vcombine.high %v121_v1, %v125_v55  ;;  %v1977_v40 = vcombine.low %v121_v1, %v125_v55 }
  0x86   :  { %v1967_v48 = vcombine.high %v120_v56, %v124_v22  ;;  %v1973_v47 = vcombine.low %v120_v56, %v124_v22 }
  0x87   :  { %919 = vmatpush1.bf16.msra.mxu0 %v1937_v24  ;;  %960 = vmatpush1.bf16.msra.mxu1 %v1941_v7  ;;  %2573 = vst [vmem:[#allocation85_spill] sm:$0xff] %v1970_v53  ;;  %v129_v7 = vld [vmem:[#allocation5 + $0x2d8] sm:$0xff]  ;;  %2575 = vst [vmem:[#allocation87_spill] sm:$0xff] %v1977_v40 }
  0x88   :  { %920 = vmatprep.subr.bf16.mxu0 %v1943_v17  ;;  %961 = vmatprep.subr.bf16.mxu1 %v1946_v33  ;;  %2572 = vst [vmem:[#allocation84_spill] sm:$0xff] %v1967_v48  ;;  %v128_v33 = vld [vmem:[#allocation5 + $0x2d0] sm:$0xff]  ;;  %v133_v24 = vld [vmem:[#allocation5 + $0x2f8] sm:$0xff]  ;;  %2574 = vst [vmem:[#allocation86_spill] sm:$0xff] %v1973_v47 }
  0x89   :  { %v132_v17 = vld [vmem:[#allocation5 + $0x2f0] sm:$0xff]  ;;  %v1982_v23 = vcombine.high %v129_v7, %v133_v24  ;;  %v1989_v55 = vcombine.low %v129_v7, %v133_v24 }
  0x8a   :  { %v1979_v12 = vcombine.high %v128_v33, %v132_v17  ;;  %v1985_v22 = vcombine.low %v128_v33, %v132_v17 }
  0x8b   :  { %921 = vmatpush1.bf16.msra.mxu0 %v1949_v39  ;;  %962 = vmatpush1.bf16.msra.mxu1 %v1953_v46  ;;  %2577 = vst [vmem:[#allocation89_spill] sm:$0xff] %v1982_v23  ;;  %v137_v46 = vld [vmem:[#allocation5 + $0x318] sm:$0xff]  ;;  %2579 = vst [vmem:[#allocation91_spill] sm:$0xff] %v1989_v55 }
  0x8c   :  { %922 = vmatprep.subr.bf16.mxu0 %v1955_v4  ;;  %963 = vmatprep.subr.bf16.mxu1 %v1958_v59  ;;  %2576 = vst [vmem:[#allocation88_spill] sm:$0xff] %v1979_v12  ;;  %v136_v59 = vld [vmem:[#allocation5 + $0x310] sm:$0xff]  ;;  %v141_v39 = vld [vmem:[#allocation5 + $0x338] sm:$0xff]  ;;  %2578 = vst [vmem:[#allocation90_spill] sm:$0xff] %v1985_v22 }
  0x8d   :  { %v140_v4 = vld [vmem:[#allocation5 + $0x330] sm:$0xff]  ;;  %v1994_v56 = vcombine.high %v137_v46, %v141_v39  ;;  %v2001_v24 = vcombine.low %v137_v46, %v141_v39 }
  0x8e   :  { %v1991_v1 = vcombine.high %v136_v59, %v140_v4  ;;  %v1997_v17 = vcombine.low %v136_v59, %v140_v4 }
  0x8f   :  { %923 = vmatpush1.bf16.msra.mxu0 %v1961_v61  ;;  %964 = vmatpush1.bf16.msra.mxu1 %v1965_v58  ;;  %2581 = vst [vmem:[#allocation93_spill] sm:$0xff] %v1994_v56  ;;  %v145_v58 = vld [vmem:[#allocation5 + $0x358] sm:$0xff] }
  0x90   :  { %924 = vmatprep.subr.bf16.mxu0 %v1967_v48  ;;  %965 = vmatprep.subr.bf16.mxu1 %v1970_v53  ;;  %2580 = vst [vmem:[#allocation92_spill] sm:$0xff] %v1991_v1  ;;  %v144_v53 = vld [vmem:[#allocation5 + $0x350] sm:$0xff]  ;;  %v149_v61 = vld [vmem:[#allocation5 + $0x378] sm:$0xff] }
  0x91   :  { %v148_v48 = vld [vmem:[#allocation5 + $0x370] sm:$0xff]  ;;  %v2006_v33 = vcombine.high %v145_v58, %v149_v61  ;;  %v2013_v39 = vcombine.low %v145_v58, %v149_v61 }
  0x92   :  { %v2003_v7 = vcombine.high %v144_v53, %v148_v48  ;;  %v2009_v4 = vcombine.low %v144_v53, %v148_v48 }
  0x93   :  { %925 = vmatpush1.bf16.msra.mxu0 %v1973_v47  ;;  %966 = vmatpush1.bf16.msra.mxu1 %v1977_v40  ;;  %2583 = vst [vmem:[#allocation95_spill] sm:$0xff] %v2006_v33  ;;  %v153_v40 = vld [vmem:[#allocation5 + $0x398] sm:$0xff] }
  0x94   :  { %926 = vmatprep.subr.bf16.mxu0 %v1979_v12  ;;  %967 = vmatprep.subr.bf16.mxu1 %v1982_v23  ;;  %2582 = vst [vmem:[#allocation94_spill] sm:$0xff] %v2003_v7  ;;  %v152_v23 = vld [vmem:[#allocation5 + $0x390] sm:$0xff]  ;;  %v157_v47 = vld [vmem:[#allocation5 + $0x3b8] sm:$0xff] }
  0x95   :  { %v156_v12 = vld [vmem:[#allocation5 + $0x3b0] sm:$0xff]  ;;  %v2018_v59 = vcombine.high %v153_v40, %v157_v47  ;;  %v2025_v61 = vcombine.low %v153_v40, %v157_v47  ;;  %v2585_v47 = vld [vmem:[#allocation16_spill] sm:$0xff] }
  0x96   :  { %v2015_v46 = vcombine.high %v152_v23, %v156_v12  ;;  %v2021_v48 = vcombine.low %v152_v23, %v156_v12  ;;  %v2586_v40 = vld [vmem:[#allocation17_spill] sm:$0xff]  ;;  %v2587_v23 = vld [vmem:[#allocation18_spill] sm:$0xff] }
  0x97   :  { %927 = vmatpush1.bf16.msra.mxu0 %v1985_v22  ;;  %968 = vmatpush1.bf16.msra.mxu1 %v1989_v55  ;;  %2584 = vst [vmem:[#allocation96_spill] sm:$0xff] %v2018_v59  ;;  %v161_v55 = vld [vmem:[#allocation5 + $0x3d8] sm:$0xff] }
  0x98   :  { %928 = vmatprep.subr.bf16.mxu0 %v1991_v1  ;;  %969 = vmatprep.subr.bf16.mxu1 %v1994_v56  ;;  %v160_v56 = vld [vmem:[#allocation5 + $0x3d0] sm:$0xff]  ;;  %v165_v22 = vld [vmem:[#allocation5 + $0x3f8] sm:$0xff] }
  0x99   :  { %v164_v1 = vld [vmem:[#allocation5 + $0x3f0] sm:$0xff]  ;;  %v2030_v53 = vcombine.high %v161_v55, %v165_v22  ;;  %v2037_v12 = vcombine.low %v161_v55, %v165_v22  ;;  %v2588_v22 = vld [vmem:[#allocation19_spill] sm:$0xff]  ;;  %v2589_v55 = vld [vmem:[#allocation20_spill] sm:$0xff] }
  0x9a   :  { %v2027_v58 = vcombine.high %v160_v56, %v164_v1 }
  0x9b   :  { %929 = vmatpush1.bf16.msra.mxu0 %v1997_v17  ;;  %970 = vmatpush1.bf16.msra.mxu1 %v2001_v24 }
  0x9c   :  { %930 = vmatprep.subr.bf16.mxu0 %v2003_v7  ;;  %971 = vmatprep.subr.bf16.mxu1 %v2006_v33  ;;  %v2033_v33 = vcombine.low %v160_v56, %v164_v1  ;;  %v2590_v1 = vld [vmem:[#allocation21_spill] sm:$0xff]  ;;  %v2591_v56 = vld [vmem:[#allocation22_spill] sm:$0xff] }
  0x9f   :  { %931 = vmatpush1.bf16.msra.mxu0 %v2009_v4  ;;  %972 = vmatpush1.bf16.msra.mxu1 %v2013_v39 }
  0xa0   :  { %932 = vmatprep.subr.bf16.mxu0 %v2015_v46  ;;  %973 = vmatprep.subr.bf16.mxu1 %v2018_v59 }
  0xa3   :  { %933 = vmatpush1.bf16.msra.mxu0 %v2021_v48  ;;  %974 = vmatpush1.bf16.msra.mxu1 %v2025_v61 }
  0xa4   :  { %934 = vmatprep.subr.bf16.mxu0 %v2027_v58  ;;  %975 = vmatprep.subr.bf16.mxu1 %v2030_v53 }
  0xa7   :  { %935 = vmatpush1.bf16.msra.mxu0 %v2033_v33  ;;  %976 = vmatpush1.bf16.msra.mxu1 %v2037_v12 }
  0xa8   :  { %986 = vmatprep.subr.bf16.mxu0 %v1634_v3  ;;  %1027 = vmatprep.subr.bf16.mxu1 %v1638_v8 }
  0xaa   :  { %937 = vmatmul.mubr.bf16.vlgmr.msra.gmra.mrb[4].mxu0 %v1846_v49  ;;  %978 = vmatmul.mubr.bf16.vlgmr.msra.gmra.mrb[4].mxu1 %v1846_v49  ;;  %v2592_v49 = vld [vmem:[#allocation23_spill] sm:$0xff] }
  0xab   :  { %987 = vmatpush1.bf16.msra.mxu0 %v1636_v5  ;;  %1028 = vmatpush1.bf16.msra.mxu1 %v1640_v9 }
  0xac   :  { %988 = vmatprep.subr.bf16.mxu0 %v1642_v10  ;;  %1029 = vmatprep.subr.bf16.mxu1 %v1645_v14 }
  0xad   :  { %1018 = vmatprep.mubr.bf16.mxu0 %v1708_v57  ;;  %1059 = vmatprep.mubr.bf16.mxu1 %v1708_v57 }
  0xaf   :  { %989 = vmatpush1.bf16.msra.mxu0 %v1649_v18  ;;  %1030 = vmatpush1.bf16.msra.mxu1 %v1653_v19 }
  0xb0   :  { %990 = vmatprep.subr.bf16.mxu0 %v1655_v20  ;;  %1031 = vmatprep.subr.bf16.mxu1 %v1658_v21 }
  0xb3   :  { %991 = vmatpush1.bf16.msra.mxu0 %v1661_v26  ;;  %1032 = vmatpush1.bf16.msra.mxu1 %v1665_v27 }
  0xb4   :  { %992 = vmatprep.subr.bf16.mxu0 %v1667_v28  ;;  %1033 = vmatprep.subr.bf16.mxu1 %v1670_v29 }
  0xb7   :  { %993 = vmatpush1.bf16.msra.mxu0 %v1673_v34  ;;  %1034 = vmatpush1.bf16.msra.mxu1 %v1677_v35 }
  0xb8   :  { %994 = vmatprep.subr.bf16.mxu0 %v1679_v36  ;;  %1035 = vmatprep.subr.bf16.mxu1 %v1682_v37 }
  0xbb   :  { %995 = vmatpush1.bf16.msra.mxu0 %v1685_v42  ;;  %1036 = vmatpush1.bf16.msra.mxu1 %v1689_v43 }
  0xbc   :  { %996 = vmatprep.subr.bf16.mxu0 %v1691_v44  ;;  %1037 = vmatprep.subr.bf16.mxu1 %v1694_v45 }
  0xbf   :  { %997 = vmatpush1.bf16.msra.mxu0 %v1697_v50  ;;  %1038 = vmatpush1.bf16.msra.mxu1 %v1701_v51 }
  0xc0   :  { %998 = vmatprep.subr.bf16.mxu0 %v1703_v52  ;;  %1039 = vmatprep.subr.bf16.mxu1 %v1706_v54 }
  0xc3   :  { %999 = vmatpush1.bf16.msra.mxu0 %v1711_v60  ;;  %1040 = vmatpush1.bf16.msra.mxu1 %v1716_v62 }
  0xc4   :  { %1000 = vmatprep.subr.bf16.mxu0 %v1718_v63  ;;  %1041 = vmatprep.subr.bf16.mxu1 %v1721_v0 }
  0xc7   :  { %1001 = vmatpush1.bf16.msra.mxu0 %v1726_v11  ;;  %1042 = vmatpush1.bf16.msra.mxu1 %v1734_v13 }
  0xc8   :  { %1002 = vmatprep.subr.bf16.mxu0 %v1736_v15  ;;  %1043 = vmatprep.subr.bf16.mxu1 %v1739_v16 }
  0xcb   :  { %1003 = vmatpush1.bf16.msra.mxu0 %v1744_v25  ;;  %1044 = vmatpush1.bf16.msra.mxu1 %v1748_v30 }
  0xcc   :  { %1004 = vmatprep.subr.bf16.mxu0 %v1750_v31  ;;  %1045 = vmatprep.subr.bf16.mxu1 %v1753_v32  ;;  %v2593_v31 = vld [vmem:[#allocation24_spill] sm:$0xff]  ;;  %v2594_v32 = vld [vmem:[#allocation25_spill] sm:$0xff] }
  0xcf   :  { %1005 = vmatpush1.bf16.msra.mxu0 %v1756_v41  ;;  %1046 = vmatpush1.bf16.msra.mxu1 %v2585_v47  ;;  %v2595_v41 = vld [vmem:[#allocation26_spill] sm:$0xff]  ;;  %v2596_v47 = vld [vmem:[#allocation27_spill] sm:$0xff] }
  0xd0   :  { %1006 = vmatprep.subr.bf16.mxu0 %v2586_v40  ;;  %1047 = vmatprep.subr.bf16.mxu1 %v2587_v23  ;;  %v2597_v40 = vld [vmem:[#allocation28_spill] sm:$0xff]  ;;  %v2598_v23 = vld [vmem:[#allocation29_spill] sm:$0xff] }
  0xd3   :  { %1007 = vmatpush1.bf16.msra.mxu0 %v2588_v22  ;;  %1048 = vmatpush1.bf16.msra.mxu1 %v2589_v55  ;;  %v2599_v22 = vld [vmem:[#allocation30_spill] sm:$0xff] }
  0xd4   :  { %1008 = vmatprep.subr.bf16.mxu0 %v2590_v1  ;;  %1049 = vmatprep.subr.bf16.mxu1 %v2591_v56  ;;  %v2600_v56 = vld [vmem:[#allocation34_spill] sm:$0xff] }
  0xd7   :  { %1009 = vmatpush1.bf16.msra.mxu0 %v2592_v49  ;;  %1050 = vmatpush1.bf16.msra.mxu1 %v2593_v31  ;;  %v2601_v49 = vld [vmem:[#allocation35_spill] sm:$0xff] }
  0xd8   :  { %1010 = vmatprep.subr.bf16.mxu0 %v2594_v32  ;;  %1051 = vmatprep.subr.bf16.mxu1 %v2595_v41  ;;  %v2602_v32 = vld [vmem:[#allocation37_spill] sm:$0xff]  ;;  %v2603_v41 = vld [vmem:[#allocation38_spill] sm:$0xff] }
  0xdb   :  { %1011 = vmatpush1.bf16.msra.mxu0 %v2596_v47  ;;  %1052 = vmatpush1.bf16.msra.mxu1 %v2597_v40  ;;  %v2604_v47 = vld [vmem:[#allocation39_spill] sm:$0xff]  ;;  %v2605_v40 = vld [vmem:[#allocation41_spill] sm:$0xff] }
  0xdc   :  { %1012 = vmatprep.subr.bf16.mxu0 %v2598_v23  ;;  %1053 = vmatprep.subr.bf16.mxu1 %v2599_v22  ;;  %v2606_v23 = vld [vmem:[#allocation42_spill] sm:$0xff]  ;;  %v2607_v22 = vld [vmem:[#allocation43_spill] sm:$0xff] }
  0xdf   :  { %1013 = vmatpush1.bf16.msra.mxu0 %v1806_v2  ;;  %1054 = vmatpush1.bf16.msra.mxu1 %v1810_v6  ;;  %v2608_v2 = vld [vmem:[#allocation44_spill] sm:$0xff]  ;;  %v2609_v6 = vld [vmem:[#allocation31_spill] sm:$0xff] }
  0xe0   :  { %1014 = vmatprep.subr.bf16.mxu0 %v2600_v56  ;;  %1055 = vmatprep.subr.bf16.mxu1 %v2601_v49  ;;  %v2610_v49 = vld [vmem:[#allocation46_spill] sm:$0xff]  ;;  %v2623_v56 = vld [vmem:[#allocation59_spill] sm:$0xff] }
  0xe3   :  { %1015 = vmatpush1.bf16.msra.mxu0 %v1819_v38  ;;  %1056 = vmatpush1.bf16.msra.mxu1 %v2602_v32  ;;  %v2611_v38 = vld [vmem:[#allocation47_spill] sm:$0xff]  ;;  %v2612_v32 = vld [vmem:[#allocation48_spill] sm:$0xff] }
  0xe4   :  { %1016 = vmatprep.subr.bf16.mxu0 %v2603_v41  ;;  %1057 = vmatprep.subr.bf16.mxu1 %v2604_v47  ;;  %v2613_v41 = vld [vmem:[#allocation49_spill] sm:$0xff]  ;;  %v2618_v47 = vld [vmem:[#allocation54_spill] sm:$0xff] }
  0xe7   :  { %1017 = vmatpush1.bf16.msra.mxu0 %v2605_v40  ;;  %1058 = vmatpush1.bf16.msra.mxu1 %v2606_v23  ;;  %v2614_v23 = vld [vmem:[#allocation50_spill] sm:$0xff]  ;;  %v2617_v40 = vld [vmem:[#allocation53_spill] sm:$0xff] }
  0xe8   :  { %1068 = vmatprep.subr.bf16.mxu0 %v2607_v22  ;;  %1109 = vmatprep.subr.bf16.mxu1 %v2608_v2  ;;  %v2615_v22 = vld [vmem:[#allocation51_spill] sm:$0xff]  ;;  %v2616_v2 = vld [vmem:[#allocation52_spill] sm:$0xff] }
  0xea   :  { %1019 = vmatmul.mubr.bf16.vlgmr.msra.gmra.mrb[0].mxu0 %v2609_v6  ;;  %1060 = vmatmul.mubr.bf16.vlgmr.msra.gmra.mrb[0].mxu1 %v2609_v6 }
  0xeb   :  { %1069 = vmatpush1.bf16.msra.mxu0 %v2610_v49  ;;  %1110 = vmatpush1.bf16.msra.mxu1 %v2611_v38  ;;  %v2619_v49 = vld [vmem:[#allocation55_spill] sm:$0xff]  ;;  %v2620_v38 = vld [vmem:[#allocation56_spill] sm:$0xff] }
  0xec   :  { %1070 = vmatprep.subr.bf16.mxu0 %v2612_v32  ;;  %1111 = vmatprep.subr.bf16.mxu1 %v2613_v41  ;;  %v2621_v32 = vld [vmem:[#allocation57_spill] sm:$0xff]  ;;  %v2622_v41 = vld [vmem:[#allocation58_spill] sm:$0xff] }
  0xed   :  { %1100 = vmatprep.mubr.bf16.mxu0 %v1708_v57  ;;  %1141 = vmatprep.mubr.bf16.mxu1 %v1708_v57  ;;  %v2624_v57 = vld [vmem:[#allocation60_spill] sm:$0xff] }
  0xef   :  { %1071 = vmatpush1.bf16.msra.mxu0 %v2614_v23  ;;  %1112 = vmatpush1.bf16.msra.mxu1 %v2615_v22  ;;  %v2625_v23 = vld [vmem:[#allocation61_spill] sm:$0xff]  ;;  %v2626_v22 = vld [vmem:[#allocation62_spill] sm:$0xff] }
  0xf0   :  { %1072 = vmatprep.subr.bf16.mxu0 %v2616_v2  ;;  %1113 = vmatprep.subr.bf16.mxu1 %v2617_v40  ;;  %v2627_v2 = vld [vmem:[#allocation63_spill] sm:$0xff]  ;;  %v2628_v40 = vld [vmem:[#allocation64_spill] sm:$0xff] }
  0xf3   :  { %1073 = vmatpush1.bf16.msra.mxu0 %v2618_v47  ;;  %1114 = vmatpush1.bf16.msra.mxu1 %v2619_v49  ;;  %v2629_v47 = vld [vmem:[#allocation65_spill] sm:$0xff]  ;;  %v2630_v49 = vld [vmem:[#allocation66_spill] sm:$0xff] }
  0xf4   :  { %1074 = vmatprep.subr.bf16.mxu0 %v2620_v38  ;;  %1115 = vmatprep.subr.bf16.mxu1 %v2621_v32  ;;  %v2631_v38 = vld [vmem:[#allocation67_spill] sm:$0xff]  ;;  %v2632_v32 = vld [vmem:[#allocation68_spill] sm:$0xff] }
  0xf7   :  { %1075 = vmatpush1.bf16.msra.mxu0 %v2622_v41  ;;  %1116 = vmatpush1.bf16.msra.mxu1 %v2623_v56  ;;  %v2633_v41 = vld [vmem:[#allocation69_spill] sm:$0xff]  ;;  %v2634_v56 = vld [vmem:[#allocation70_spill] sm:$0xff] }
  0xf8   :  { %1076 = vmatprep.subr.bf16.mxu0 %v2624_v57  ;;  %1117 = vmatprep.subr.bf16.mxu1 %v2625_v23  ;;  %v2635_v57 = vld [vmem:[#allocation71_spill] sm:$0xff]  ;;  %v2636_v23 = vld [vmem:[#allocation72_spill] sm:$0xff] }
  0xfb   :  { %1077 = vmatpush1.bf16.msra.mxu0 %v2626_v22  ;;  %1118 = vmatpush1.bf16.msra.mxu1 %v2627_v2  ;;  %v2637_v22 = vld [vmem:[#allocation73_spill] sm:$0xff]  ;;  %v2638_v2 = vld [vmem:[#allocation74_spill] sm:$0xff] }
  0xfc   :  { %1078 = vmatprep.subr.bf16.mxu0 %v2628_v40  ;;  %1119 = vmatprep.subr.bf16.mxu1 %v2629_v47  ;;  %v2639_v40 = vld [vmem:[#allocation75_spill] sm:$0xff]  ;;  %v2640_v47 = vld [vmem:[#allocation76_spill] sm:$0xff] }
  0xff   :  { %1079 = vmatpush1.bf16.msra.mxu0 %v2630_v49  ;;  %1120 = vmatpush1.bf16.msra.mxu1 %v2631_v38  ;;  %v2641_v49 = vld [vmem:[#allocation77_spill] sm:$0xff]  ;;  %v2642_v38 = vld [vmem:[#allocation78_spill] sm:$0xff] }
 0x100   :  { %1080 = vmatprep.subr.bf16.mxu0 %v2632_v32  ;;  %1121 = vmatprep.subr.bf16.mxu1 %v2633_v41  ;;  %v2643_v32 = vld [vmem:[#allocation79_spill] sm:$0xff]  ;;  %v2644_v41 = vld [vmem:[#allocation80_spill] sm:$0xff] }
 0x103   :  { %1081 = vmatpush1.bf16.msra.mxu0 %v2634_v56  ;;  %1122 = vmatpush1.bf16.msra.mxu1 %v2635_v57  ;;  %v2645_v56 = vld [vmem:[#allocation81_spill] sm:$0xff]  ;;  %v2646_v57 = vld [vmem:[#allocation82_spill] sm:$0xff] }
 0x104   :  { %1082 = vmatprep.subr.bf16.mxu0 %v2636_v23  ;;  %1123 = vmatprep.subr.bf16.mxu1 %v2637_v22  ;;  %v2647_v23 = vld [vmem:[#allocation83_spill] sm:$0xff]  ;;  %v2648_v22 = vld [vmem:[#allocation84_spill] sm:$0xff] }
 0x107   :  { %1083 = vmatpush1.bf16.msra.mxu0 %v2638_v2  ;;  %1124 = vmatpush1.bf16.msra.mxu1 %v2639_v40  ;;  %v2649_v2 = vld [vmem:[#allocation85_spill] sm:$0xff]  ;;  %v2650_v40 = vld [vmem:[#allocation86_spill] sm:$0xff] }
 0x108   :  { %1084 = vmatprep.subr.bf16.mxu0 %v2640_v47  ;;  %1125 = vmatprep.subr.bf16.mxu1 %v2641_v49  ;;  %v2651_v47 = vld [vmem:[#allocation87_spill] sm:$0xff]  ;;  %v2652_v49 = vld [vmem:[#allocation88_spill] sm:$0xff] }
 0x10b   :  { %1085 = vmatpush1.bf16.msra.mxu0 %v2642_v38  ;;  %1126 = vmatpush1.bf16.msra.mxu1 %v2643_v32  ;;  %v2653_v38 = vld [vmem:[#allocation89_spill] sm:$0xff]  ;;  %v2654_v32 = vld [vmem:[#allocation90_spill] sm:$0xff] }
 0x10c   :  { %1086 = vmatprep.subr.bf16.mxu0 %v2644_v41  ;;  %1127 = vmatprep.subr.bf16.mxu1 %v2645_v56  ;;  %v2655_v41 = vld [vmem:[#allocation91_spill] sm:$0xff]  ;;  %v2656_v56 = vld [vmem:[#allocation92_spill] sm:$0xff] }
 0x10f   :  { %1087 = vmatpush1.bf16.msra.mxu0 %v2646_v57  ;;  %1128 = vmatpush1.bf16.msra.mxu1 %v2647_v23  ;;  %v2657_v57 = vld [vmem:[#allocation93_spill] sm:$0xff] }
 0x110   :  { %1088 = vmatprep.subr.bf16.mxu0 %v2648_v22  ;;  %1129 = vmatprep.subr.bf16.mxu1 %v2649_v2 }
 0x113   :  { %1089 = vmatpush1.bf16.msra.mxu0 %v2650_v40  ;;  %1130 = vmatpush1.bf16.msra.mxu1 %v2651_v47  ;;  %v2658_v40 = vld [vmem:[#allocation95_spill] sm:$0xff] }
 0x114   :  { %1090 = vmatprep.subr.bf16.mxu0 %v2652_v49  ;;  %1131 = vmatprep.subr.bf16.mxu1 %v2653_v38 }
 0x117   :  { %1091 = vmatpush1.bf16.msra.mxu0 %v2654_v32  ;;  %1132 = vmatpush1.bf16.msra.mxu1 %v2655_v41  ;;  %v2659_v41 = vld [vmem:[#allocation12_spill] sm:$0xff] }
 0x118   :  { %1092 = vmatprep.subr.bf16.mxu0 %v2656_v56  ;;  %1133 = vmatprep.subr.bf16.mxu1 %v2657_v57  ;;  %v177_v56 = vunpack.c.l.bf16 %v2659_v41  ;;  %v2695_v41 = vld [vmem:[#allocation51_spill] sm:$0xff] }
 0x11b   :  { %1093 = vmatpush1.bf16.msra.mxu0 %v1997_v17  ;;  %1134 = vmatpush1.bf16.msra.mxu1 %v2001_v24 }
 0x11c   :  { %1094 = vmatprep.subr.bf16.mxu0 %v2003_v7  ;;  %1135 = vmatprep.subr.bf16.mxu1 %v2658_v40  ;;  %v2660_v7 = vld [vmem:[#allocation11_spill] sm:$0xff] }
 0x11d   :  { %v179_v40 = vsub.f32 %v2660_v7, %v177_v56  ;;  %v2697_v7 = vld [vmem:[#allocation53_spill] sm:$0xff] }
 0x11e   :  { %v2701_v56 = vld [vmem:[#allocation57_spill] sm:$0xff] }
 0x11f   :  { %1095 = vmatpush1.bf16.msra.mxu0 %v2009_v4  ;;  %1136 = vmatpush1.bf16.msra.mxu1 %v2013_v39 }
 0x120   :  { %1096 = vmatprep.subr.bf16.mxu0 %v2015_v46  ;;  %1137 = vmatprep.subr.bf16.mxu1 %v2018_v59  ;;  %v2182_v59 = vpack.c.bf16 %v179_v40, %v179_v40  ;;  %v2698_v40 = vld [vmem:[#allocation54_spill] sm:$0xff] }
 0x123   :  { %1097 = vmatpush1.bf16.msra.mxu0 %v2021_v48  ;;  %1138 = vmatpush1.bf16.msra.mxu1 %v2025_v61 }
 0x124   :  { %1098 = vmatprep.subr.bf16.mxu0 %v2027_v58  ;;  %1139 = vmatprep.subr.bf16.mxu1 %v2030_v53 }
 0x127   :  { %1099 = vmatpush1.bf16.msra.mxu0 %v2033_v33  ;;  %1140 = vmatpush1.bf16.msra.mxu1 %v2037_v12 }
 0x128   :  { %1150 = vmatprep.subr.bf16.mxu0 %v1634_v3  ;;  %1191 = vmatprep.subr.bf16.mxu1 %v1638_v8  ;;  %v2661_v3 = vld [vmem:[#allocation13_spill] sm:$0xff]  ;;  %v2663_v8 = vld [vmem:[#allocation15_spill] sm:$0xff] }
 0x12a   :  { %1101 = vmatmul.mubr.bf16.vlgmr.msra.gmra.mrb[4].mxu0 %v2609_v6  ;;  %1142 = vmatmul.mubr.bf16.vlgmr.msra.gmra.mrb[4].mxu1 %v2609_v6  ;;  %v2696_v6 = vld [vmem:[#allocation52_spill] sm:$0xff] }
 0x12b   :  { %1151 = vmatpush1.bf16.msra.mxu0 %v1636_v5  ;;  %1192 = vmatpush1.bf16.msra.mxu1 %v1640_v9  ;;  %v2662_v5 = vld [vmem:[#allocation14_spill] sm:$0xff]  ;;  %v2664_v9 = vld [vmem:[#allocation16_spill] sm:$0xff] }
 0x12c   :  { %1152 = vmatprep.subr.bf16.mxu0 %v1642_v10  ;;  %1193 = vmatprep.subr.bf16.mxu1 %v1645_v14  ;;  %v2665_v10 = vld [vmem:[#allocation17_spill] sm:$0xff]  ;;  %v2666_v14 = vld [vmem:[#allocation18_spill] sm:$0xff] }
 0x12d   :  { %1182 = vmatprep.mubr.bf16.mxu0 %v2182_v59  ;;  %1223 = vmatprep.mubr.bf16.mxu1 %v2182_v59 }
 0x12f   :  { %1153 = vmatpush1.bf16.msra.mxu0 %v1649_v18  ;;  %1194 = vmatpush1.bf16.msra.mxu1 %v1653_v19  ;;  %v2667_v18 = vld [vmem:[#allocation19_spill] sm:$0xff]  ;;  %v2668_v19 = vld [vmem:[#allocation22_spill] sm:$0xff] }
 0x130   :  { %1154 = vmatprep.subr.bf16.mxu0 %v1655_v20  ;;  %1195 = vmatprep.subr.bf16.mxu1 %v1658_v21  ;;  %v2669_v20 = vld [vmem:[#allocation23_spill] sm:$0xff]  ;;  %v2670_v21 = vld [vmem:[#allocation25_spill] sm:$0xff] }
 0x133   :  { %1155 = vmatpush1.bf16.msra.mxu0 %v1661_v26  ;;  %1196 = vmatpush1.bf16.msra.mxu1 %v1665_v27  ;;  %v2671_v26 = vld [vmem:[#allocation26_spill] sm:$0xff]  ;;  %v2672_v27 = vld [vmem:[#allocation27_spill] sm:$0xff] }
 0x134   :  { %1156 = vmatprep.subr.bf16.mxu0 %v1667_v28  ;;  %1197 = vmatprep.subr.bf16.mxu1 %v1670_v29  ;;  %v2673_v28 = vld [vmem:[#allocation28_spill] sm:$0xff]  ;;  %v2674_v29 = vld [vmem:[#allocation29_spill] sm:$0xff] }
 0x137   :  { %1157 = vmatpush1.bf16.msra.mxu0 %v1673_v34  ;;  %1198 = vmatpush1.bf16.msra.mxu1 %v1677_v35  ;;  %v2675_v34 = vld [vmem:[#allocation30_spill] sm:$0xff]  ;;  %v2676_v35 = vld [vmem:[#allocation45_spill] sm:$0xff] }
 0x138   :  { %1158 = vmatprep.subr.bf16.mxu0 %v1679_v36  ;;  %1199 = vmatprep.subr.bf16.mxu1 %v1682_v37  ;;  %v176_v36 = vunpack.c.l.bf16 %v2676_v35  ;;  %v2677_v37 = vld [vmem:[#allocation32_spill] sm:$0xff]  ;;  %v2718_v35 = vld [vmem:[#allocation74_spill] sm:$0xff] }
 0x13b   :  { %1159 = vmatpush1.bf16.msra.mxu0 %v1685_v42  ;;  %1200 = vmatpush1.bf16.msra.mxu1 %v1689_v43  ;;  %v2678_v42 = vld [vmem:[#allocation33_spill] sm:$0xff]  ;;  %v2679_v43 = vld [vmem:[#allocation34_spill] sm:$0xff] }
 0x13c   :  { %1160 = vmatprep.subr.bf16.mxu0 %v1691_v44  ;;  %1201 = vmatprep.subr.bf16.mxu1 %v1694_v45  ;;  %v2680_v44 = vld [vmem:[#allocation35_spill] sm:$0xff]  ;;  %v2681_v45 = vld [vmem:[#allocation40_spill] sm:$0xff] }
 0x13f   :  { %1161 = vmatpush1.bf16.msra.mxu0 %v1697_v50  ;;  %1202 = vmatpush1.bf16.msra.mxu1 %v1701_v51  ;;  %v178_v50 = vsub.f32 %v2681_v45, %v176_v36  ;;  %v2682_v51 = vld [vmem:[#allocation36_spill] sm:$0xff]  ;;  %v2719_v36 = vld [vmem:[#allocation75_spill] sm:$0xff] }
 0x140   :  { %1162 = vmatprep.subr.bf16.mxu0 %v1703_v52  ;;  %1203 = vmatprep.subr.bf16.mxu1 %v1706_v54  ;;  %v2683_v52 = vld [vmem:[#allocation37_spill] sm:$0xff]  ;;  %v2684_v54 = vld [vmem:[#allocation38_spill] sm:$0xff]  ;;  %v2724_v45 = vld [vmem:[#allocation80_spill] sm:$0xff] }
 0x143   :  { %1163 = vmatpush1.bf16.msra.mxu0 %v1711_v60  ;;  %1204 = vmatpush1.bf16.msra.mxu1 %v1716_v62  ;;  %v2685_v60 = vld [vmem:[#allocation39_spill] sm:$0xff]  ;;  %v2250_v62 = vpack.c.bf16 %v178_v50, %v178_v50  ;;  %v2725_v50 = vld [vmem:[#allocation81_spill] sm:$0xff] }
 0x144   :  { %1164 = vmatprep.subr.bf16.mxu0 %v1718_v63  ;;  %1205 = vmatprep.subr.bf16.mxu1 %v1721_v0  ;;  %v2686_v63 = vld [vmem:[#allocation41_spill] sm:$0xff]  ;;  %v2687_v0 = vld [vmem:[#allocation42_spill] sm:$0xff] }
 0x147   :  { %1165 = vmatpush1.bf16.msra.mxu0 %v1726_v11  ;;  %1206 = vmatpush1.bf16.msra.mxu1 %v1734_v13  ;;  %v2688_v11 = vld [vmem:[#allocation43_spill] sm:$0xff]  ;;  %v2689_v13 = vld [vmem:[#allocation44_spill] sm:$0xff] }
 0x148   :  { %1166 = vmatprep.subr.bf16.mxu0 %v1736_v15  ;;  %1207 = vmatprep.subr.bf16.mxu1 %v1739_v16  ;;  %v2690_v15 = vld [vmem:[#allocation46_spill] sm:$0xff]  ;;  %v2691_v16 = vld [vmem:[#allocation47_spill] sm:$0xff] }
 0x14b   :  { %1167 = vmatpush1.bf16.msra.mxu0 %v1744_v25  ;;  %1208 = vmatpush1.bf16.msra.mxu1 %v1748_v30  ;;  %v2692_v25 = vld [vmem:[#allocation48_spill] sm:$0xff]  ;;  %v2693_v30 = vld [vmem:[#allocation49_spill] sm:$0xff] }
 0x14c   :  { %1168 = vmatprep.subr.bf16.mxu0 %v2661_v3  ;;  %1209 = vmatprep.subr.bf16.mxu1 %v2662_v5  ;;  %v2702_v3 = vld [vmem:[#allocation58_spill] sm:$0xff]  ;;  %v2703_v5 = vld [vmem:[#allocation59_spill] sm:$0xff] }
 0x14f   :  { %1169 = vmatpush1.bf16.msra.mxu0 %v2663_v8  ;;  %1210 = vmatpush1.bf16.msra.mxu1 %v2664_v9  ;;  %v2705_v8 = vld [vmem:[#allocation61_spill] sm:$0xff]  ;;  %v2706_v9 = vld [vmem:[#allocation62_spill] sm:$0xff] }
 0x150   :  { %1170 = vmatprep.subr.bf16.mxu0 %v2665_v10  ;;  %1211 = vmatprep.subr.bf16.mxu1 %v2666_v14  ;;  %v2707_v10 = vld [vmem:[#allocation63_spill] sm:$0xff]  ;;  %v2708_v14 = vld [vmem:[#allocation64_spill] sm:$0xff] }
 0x153   :  { %1171 = vmatpush1.bf16.msra.mxu0 %v2667_v18  ;;  %1212 = vmatpush1.bf16.msra.mxu1 %v2589_v55  ;;  %v2699_v55 = vld [vmem:[#allocation55_spill] sm:$0xff]  ;;  %v2709_v18 = vld [vmem:[#allocation65_spill] sm:$0xff] }
 0x154   :  { %1172 = vmatprep.subr.bf16.mxu0 %v2590_v1  ;;  %1213 = vmatprep.subr.bf16.mxu1 %v2668_v19  ;;  %v2700_v1 = vld [vmem:[#allocation56_spill] sm:$0xff]  ;;  %v2710_v19 = vld [vmem:[#allocation66_spill] sm:$0xff] }
 0x157   :  { %1173 = vmatpush1.bf16.msra.mxu0 %v2669_v20  ;;  %1214 = vmatpush1.bf16.msra.mxu1 %v2593_v31  ;;  %v2694_v31 = vld [vmem:[#allocation50_spill] sm:$0xff]  ;;  %v2711_v20 = vld [vmem:[#allocation67_spill] sm:$0xff] }
 0x158   :  { %1174 = vmatprep.subr.bf16.mxu0 %v2670_v21  ;;  %1215 = vmatprep.subr.bf16.mxu1 %v2671_v26  ;;  %v2712_v21 = vld [vmem:[#allocation68_spill] sm:$0xff]  ;;  %v2713_v26 = vld [vmem:[#allocation69_spill] sm:$0xff] }
 0x15b   :  { %1175 = vmatpush1.bf16.msra.mxu0 %v2672_v27  ;;  %1216 = vmatpush1.bf16.msra.mxu1 %v2673_v28  ;;  %v2714_v27 = vld [vmem:[#allocation70_spill] sm:$0xff]  ;;  %v2715_v28 = vld [vmem:[#allocation71_spill] sm:$0xff] }
 0x15c   :  { %1176 = vmatprep.subr.bf16.mxu0 %v2674_v29  ;;  %1217 = vmatprep.subr.bf16.mxu1 %v2675_v34  ;;  %v2716_v29 = vld [vmem:[#allocation72_spill] sm:$0xff]  ;;  %v2717_v34 = vld [vmem:[#allocation73_spill] sm:$0xff] }
 0x15f   :  { %1177 = vmatpush1.bf16.msra.mxu0 %v2677_v37  ;;  %1218 = vmatpush1.bf16.msra.mxu1 %v2678_v42  ;;  %v2720_v37 = vld [vmem:[#allocation76_spill] sm:$0xff]  ;;  %v2721_v42 = vld [vmem:[#allocation77_spill] sm:$0xff] }
 0x160   :  { %1178 = vmatprep.subr.bf16.mxu0 %v2679_v43  ;;  %1219 = vmatprep.subr.bf16.mxu1 %v2680_v44  ;;  %v2722_v43 = vld [vmem:[#allocation78_spill] sm:$0xff]  ;;  %v2723_v44 = vld [vmem:[#allocation79_spill] sm:$0xff] }
 0x163   :  { %1179 = vmatpush1.bf16.msra.mxu0 %v2682_v51  ;;  %1220 = vmatpush1.bf16.msra.mxu1 %v2683_v52  ;;  %v2726_v51 = vld [vmem:[#allocation82_spill] sm:$0xff] }
 0x164   :  { %1180 = vmatprep.subr.bf16.mxu0 %v2684_v54  ;;  %1221 = vmatprep.subr.bf16.mxu1 %v2685_v60  ;;  %v2727_v52 = vld [vmem:[#allocation86_spill] sm:$0xff]  ;;  %v2728_v54 = vld [vmem:[#allocation91_spill] sm:$0xff]  ;;  %v2729_v60 = vld [vmem:[#allocation92_spill] sm:$0xff] }
 0x167   :  { %1181 = vmatpush1.bf16.msra.mxu0 %v2686_v63  ;;  %1222 = vmatpush1.bf16.msra.mxu1 %v2687_v0 }
 0x168   :  { %1232 = vmatprep.subr.bf16.mxu0 %v2688_v11  ;;  %1273 = vmatprep.subr.bf16.mxu1 %v2689_v13 }
 0x16a   :  { %1183 = vmatmul.mubr.bf16.vlgmr.msra.gmra.mrb[0].mxu0 %v2250_v62  ;;  %1224 = vmatmul.mubr.bf16.vlgmr.msra.gmra.mrb[0].mxu1 %v2250_v62 }
 0x16b   :  { %1233 = vmatpush1.bf16.msra.mxu0 %v2690_v15  ;;  %1274 = vmatpush1.bf16.msra.mxu1 %v2691_v16 }
 0x16c   :  { %1234 = vmatprep.subr.bf16.mxu0 %v2692_v25  ;;  %1275 = vmatprep.subr.bf16.mxu1 %v2693_v30 }
 0x16d   :  { %1264 = vmatprep.mubr.bf16.mxu0 %v2182_v59  ;;  %1305 = vmatprep.mubr.bf16.mxu1 %v2182_v59  ;;  %v2704_v59 = vld [vmem:[#allocation60_spill] sm:$0xff] }
 0x16f   :  { %1235 = vmatpush1.bf16.msra.mxu0 %v2694_v31  ;;  %1276 = vmatpush1.bf16.msra.mxu1 %v2695_v41 }
 0x170   :  { %1236 = vmatprep.subr.bf16.mxu0 %v2696_v6  ;;  %1277 = vmatprep.subr.bf16.mxu1 %v2697_v7 }
 0x173   :  { %1237 = vmatpush1.bf16.msra.mxu0 %v2698_v40  ;;  %1278 = vmatpush1.bf16.msra.mxu1 %v2699_v55 }
 0x174   :  { %1238 = vmatprep.subr.bf16.mxu0 %v2700_v1  ;;  %1279 = vmatprep.subr.bf16.mxu1 %v2701_v56 }
 0x177   :  { %1239 = vmatpush1.bf16.msra.mxu0 %v2702_v3  ;;  %1280 = vmatpush1.bf16.msra.mxu1 %v2703_v5 }
 0x178   :  { %1240 = vmatprep.subr.bf16.mxu0 %v2704_v59  ;;  %1281 = vmatprep.subr.bf16.mxu1 %v2705_v8 }
 0x17b   :  { %1241 = vmatpush1.bf16.msra.mxu0 %v2706_v9  ;;  %1282 = vmatpush1.bf16.msra.mxu1 %v2707_v10 }
 0x17c   :  { %1242 = vmatprep.subr.bf16.mxu0 %v2708_v14  ;;  %1283 = vmatprep.subr.bf16.mxu1 %v2709_v18 }
 0x17f   :  { %1243 = vmatpush1.bf16.msra.mxu0 %v2710_v19  ;;  %1284 = vmatpush1.bf16.msra.mxu1 %v2711_v20 }
 0x180   :  { %1244 = vmatprep.subr.bf16.mxu0 %v2712_v21  ;;  %1285 = vmatprep.subr.bf16.mxu1 %v2713_v26 }
 0x183   :  { %1245 = vmatpush1.bf16.msra.mxu0 %v2714_v27  ;;  %1286 = vmatpush1.bf16.msra.mxu1 %v2715_v28 }
 0x184   :  { %1246 = vmatprep.subr.bf16.mxu0 %v2716_v29  ;;  %1287 = vmatprep.subr.bf16.mxu1 %v2717_v34 }
 0x187   :  { %1247 = vmatpush1.bf16.msra.mxu0 %v2718_v35  ;;  %1288 = vmatpush1.bf16.msra.mxu1 %v2719_v36 }
 0x188   :  { %1248 = vmatprep.subr.bf16.mxu0 %v2720_v37  ;;  %1289 = vmatprep.subr.bf16.mxu1 %v2721_v42 }
 0x18b   :  { %1249 = vmatpush1.bf16.msra.mxu0 %v2722_v43  ;;  %1290 = vmatpush1.bf16.msra.mxu1 %v2723_v44 }
 0x18c   :  { %1250 = vmatprep.subr.bf16.mxu0 %v2724_v45  ;;  %1291 = vmatprep.subr.bf16.mxu1 %v2725_v50 }
 0x18f   :  { %1251 = vmatpush1.bf16.msra.mxu0 %v2726_v51  ;;  %1292 = vmatpush1.bf16.msra.mxu1 %v2647_v23  ;;  %v2731_v23 = vld [vmem:[#allocation95_spill] sm:$0xff] }
 0x190   :  { %1252 = vmatprep.subr.bf16.mxu0 %v2648_v22  ;;  %1293 = vmatprep.subr.bf16.mxu1 %v2649_v2  ;;  %v2730_v2 = vld [vmem:[#allocation94_spill] sm:$0xff] }
 0x193   :  { %1253 = vmatpush1.bf16.msra.mxu0 %v2727_v52  ;;  %1294 = vmatpush1.bf16.msra.mxu1 %v2651_v47 }
 0x194   :  { %1254 = vmatprep.subr.bf16.mxu0 %v2652_v49  ;;  %1295 = vmatprep.subr.bf16.mxu1 %v2653_v38 }
 0x197   :  { %1255 = vmatpush1.bf16.msra.mxu0 %v2654_v32  ;;  %1296 = vmatpush1.bf16.msra.mxu1 %v2728_v54  ;;  %v2732_v32 = vld [vmem:[#allocation96_spill] sm:$0xff] }
 0x198   :  { %1256 = vmatprep.subr.bf16.mxu0 %v2729_v60  ;;  %1297 = vmatprep.subr.bf16.mxu1 %v2657_v57 }
 0x19b   :  { %1257 = vmatpush1.bf16.msra.mxu0 %v1997_v17  ;;  %1298 = vmatpush1.bf16.msra.mxu1 %v2001_v24 }
 0x19c   :  { %1258 = vmatprep.subr.bf16.mxu0 %v2730_v2  ;;  %1299 = vmatprep.subr.bf16.mxu1 %v2731_v23 }
 0x19f   :  { %1259 = vmatpush1.bf16.msra.mxu0 %v2009_v4  ;;  %1300 = vmatpush1.bf16.msra.mxu1 %v2013_v39 }
 0x1a0   :  { %1260 = vmatprep.subr.bf16.mxu0 %v2015_v46  ;;  %1301 = vmatprep.subr.bf16.mxu1 %v2732_v32 }
 0x1a3   :  { %1261 = vmatpush1.bf16.msra.mxu0 %v2021_v48  ;;  %1302 = vmatpush1.bf16.msra.mxu1 %v2025_v61 }
 0x1a4   :  { %1262 = vmatprep.subr.bf16.mxu0 %v2027_v58  ;;  %1303 = vmatprep.subr.bf16.mxu1 %v2030_v53 }
 0x1a7   :  { %1263 = vmatpush1.bf16.msra.mxu0 %v2033_v33  ;;  %1304 = vmatpush1.bf16.msra.mxu1 %v2037_v12 }
 0x1aa   :  { %1265 = vmatmul.mubr.bf16.vlgmr.msra.gmra.mrb[4].mxu0 %v2250_v62  ;;  %1306 = vmatmul.mubr.bf16.vlgmr.msra.gmra.mrb[4].mxu1 %v2250_v62 }
 0x23d   :  { %v1184_v38 = vpop.f32.mrb[0].mxu0  ;;  %v1225_v49 = vpop.f32.mrb[0].mxu1 }
 0x23e   :  { %1322 = vst [vmem:[#allocation7] sm:$0xff] %v1184_v38  ;;  %v1186_v17 = vpop.f32.mrb[1].mxu0  ;;  %1324 = vst [vmem:[#allocation7 + $0x10] sm:$0xff] %v1225_v49  ;;  %v1227_v24 = vpop.f32.mrb[1].mxu1 }
 0x23f   :  { %1323 = vst [vmem:[#allocation7 + $0x8] sm:$0xff] %v1186_v17  ;;  %v1188_v4 = vpop.f32.mrb[2].mxu0  ;;  %1325 = vst [vmem:[#allocation7 + $0x18] sm:$0xff] %v1227_v24  ;;  %v1229_v39 = vpop.f32.mrb[2].mxu1 }
 0x240   :  { %v1189_v46 = vpop.f32.mrb[3].mxu0  ;;  %v1230_v48 = vpop.f32.mrb[3].mxu1 }
 0x27d   :  { %v1266_v33 = vpop.f32.mrb[4].mxu0  ;;  %v1307_v61 = vpop.f32.mrb[4].mxu1 }
 0x27e   :  { %1326 = vst [vmem:[#allocation7 + $0x20] sm:$0xff] %v1266_v33  ;;  %v1268_v58 = vpop.f32.mrb[5].mxu0  ;;  %1328 = vst [vmem:[#allocation7 + $0x30] sm:$0xff] %v1307_v61  ;;  %v1309_v53 = vpop.f32.mrb[5].mxu1 }
 0x27f   :  { %1327 = vst [vmem:[#allocation7 + $0x28] sm:$0xff] %v1268_v58  ;;  %v1270_v12 = vpop.f32.mrb[6].mxu0  ;;  %1329 = vst [vmem:[#allocation7 + $0x38] sm:$0xff] %v1309_v53  ;;  %v1311_v47 = vpop.f32.mrb[6].mxu1 }
 0x280   :  { %v1271_v22 = vpop.f32.mrb[7].mxu0  ;;  %v1312_v57 = vpop.f32.mrb[7].mxu1 }
 0x281   :  { %1566 = shalt.err (!%p1563_p6)
}
 0x282   :  { %s1567_s10 = scalar_lea.hbm %s2338_s2, 1024 }
 0x283   :  { %p1568_p7 = scmp.ne.s32.totalorder %s2338_s2, %s1567_s10  ;;  %p1571_p8 = scmp.lt.u32.totalorder %s1567_s10, %s2338_s2 }
 0x285   :  { %p1573_p9 = pnand %p1571_p8, %p1568_p7 }
 0x287   :  { %1576 = shalt.err (!%p1573_p9)
}
 0x288   :  { %1339 = dma.vmem_to_hbm [thread:$0]  %s1337_s6, 1024, %s2338_s2, [#allocation4]  }
 0x289   :  { %1581 = dma.done.wait [#allocation4], 1024  }
 0x28a   :  { %1582 = vsyncadd [#allocation4], 4294966272 }
 0x28b   :  { %1343 = vsyncpa [#allocation3], 1 }
 0x28c   :  { %1344 = vsyncpa [#allocation6], 1 }
 0x28d   :  { %1345 = vsyncpa [#allocation4], 1 }

</bundles_post_ra>
